<compile_context>
chip_gen: v7x
topology: tpu7x:2x2x1
jax: 0.10.0
libtpu: 0.0.40
codegen_flags: <defaults>
</compile_context>

<pallas_src>
import math
import functools

import jax
import jax.numpy as jnp
from jax import lax
from jax.experimental import pallas as pl
from jax.experimental.pallas import tpu as pltpu


MM_DTYPE = jnp.float32       # flip to jnp.bfloat16 for ~4x MXU throughput at scaled dims
APPROX_RECIP = False         # exact softmax denominator for parity with PyTorch
NEG_INF = -1e9


# ----------------------------------------------------------------------------
# In-kernel helpers (pure functions on jnp values living in vregs/VMEM)
# ----------------------------------------------------------------------------

def _mm(a, b):
    return jnp.dot(a.astype(MM_DTYPE), b.astype(MM_DTYPE),
                   preferred_element_type=jnp.float32)


def _layernorm(h, g, b, eps=1e-5):
    mean = jnp.mean(h, axis=-1, keepdims=True)
    var = jnp.mean((h - mean) ** 2, axis=-1, keepdims=True)
    return (h - mean) * lax.rsqrt(var + eps) * g + b


def _softmax_rows(scores):
    scores = scores - jnp.max(scores, axis=-1, keepdims=True)
    e = jnp.exp(scores)
    return e * pl.reciprocal(jnp.sum(e, axis=-1, keepdims=True), approx=APPROX_RECIP)


def _mha(xq, xkv, wqkv, bqkv, wo, bo, mask, n_head, *, fused_qkv):
    """Multi-head attention with lane-dense fused projections.

    xq: (Sq, D), xkv: (Sk, D)
    wqkv: (D, 3D), bqkv: (1, 3D), wo: (D, D), bo: (1, D)
    mask: None or (Sq, Sk) additive float mask.
    """
    Sq, D = xq.shape
    dh = D // n_head
    scale = 1.0 / math.sqrt(dh)

    if fused_qkv:                                   # self-attention: one MXU pass
        qkv = _mm(xq, wqkv) + bqkv                  # (Sq, 3D)
        q, k, v = qkv[:, :D], qkv[:, D:2 * D], qkv[:, 2 * D:]
    else:                                           # cross-attention: q from xq, kv from xkv
        q = _mm(xq, wqkv[:, :D]) + bqkv[:, :D]
        kv = _mm(xkv, wqkv[:, D:]) + bqkv[:, D:]
        k, v = kv[:, :D], kv[:, D:]

    ctx_heads = []
    for h in range(n_head):                         # static unroll; values stay in vregs
        sl = slice(h * dh, (h + 1) * dh)
        qh, kh, vh = q[:, sl], k[:, sl], v[:, sl]
        s = lax.dot_general(qh.astype(MM_DTYPE), kh.astype(MM_DTYPE),
                            (((1,), (1,)), ((), ())),
                            preferred_element_type=jnp.float32) * scale  # (Sq, Sk)
        if mask is not None:
            s = s + mask
        p = _softmax_rows(s)
        ctx_heads.append(_mm(p, vh))                # (Sq, dh)

    ctx = jnp.concatenate(ctx_heads, axis=-1)       # (Sq, D) concat-heads
    return _mm(ctx, wo) + bo                        # single lane-dense out projection


# ----------------------------------------------------------------------------
# Fused FNet encoder STACK: one pallas_call, grid = (batch, layer)
# ----------------------------------------------------------------------------

def _enc_stack_kernel(x_ref, csd_ref, csnss_ref,
                      lnw_ref, lnb_ref, w1_ref, b1_ref, w2_ref, b2_ref,
                      out_ref, act_ref):
    l = pl.program_id(1)

    @pl.when(l == 0)
    def _():
        act_ref[...] = x_ref[0]                     # load embeddings once per batch item

    x = act_ref[...]                                # (S, D) running activation
    S, D = x.shape

    # Re(FFT2(x)) = [C_S | -S_S] @ [[x C_D], [x S_D]]   (one MXU pass per side)
    xd = _mm(x, csd_ref[...])                                     # (S, 2D)
    xd2 = jnp.concatenate([xd[:, :D], xd[:, D:]], axis=0)         # (2S, D)
    mix = _mm(csnss_ref[...], xd2)                                # (S, D)

    h = _layernorm(x + mix, lnw_ref[0, 0:1], lnb_ref[0, 0:1])

    ff = jnp.maximum(_mm(h, w1_ref[0]) + b1_ref[0], 0.0)
    ff = _mm(ff, w2_ref[0]) + b2_ref[0]
    y = _layernorm(h + ff, lnw_ref[0, 1:2], lnb_ref[0, 1:2])

    act_ref[...] = y                                # carry to next layer
    out_ref[0, 0] = y                               # per-layer output (decoder memory)


def fnet_encoder_stack(x, ep, dft):
    B, S, D = x.shape
    L, _, F = ep["w1"].shape
    lw = lambda shape: pl.BlockSpec(shape, lambda b, l: (l,) + (0,) * (len(shape) - 1))

    return pl.pallas_call(
        _enc_stack_kernel,
        out_shape=jax.ShapeDtypeStruct((L, B, S, D), jnp.float32),
        grid=(B, L),
        in_specs=[
            pl.BlockSpec((1, S, D), lambda b, l: (b, 0, 0)),       # embeddings
            pl.BlockSpec((D, 2 * D), lambda b, l: (0, 0)),         # [C_D | S_D]
            pl.BlockSpec((S, 2 * S), lambda b, l: (0, 0)),         # [C_S | -S_S]
            lw((1, 2, D)), lw((1, 2, D)),                          # LN gamma/beta
            lw((1, D, F)), lw((1, 1, F)),                          # FFN w1/b1
            lw((1, F, D)), lw((1, 1, D)),                          # FFN w2/b2
        ],
        out_specs=pl.BlockSpec((1, 1, S, D), lambda b, l: (l, b, 0, 0)),
        scratch_shapes=[pltpu.VMEM((S, D), jnp.float32)],
        compiler_params=pltpu.CompilerParams(
            dimension_semantics=("parallel", "arbitrary")),
    )(x, dft["cos_sin_d"], dft["cos_negsin_s"],
      ep["ln_w"], ep["ln_b"], ep["w1"], ep["b1"], ep["w2"], ep["b2"])


# ----------------------------------------------------------------------------
# Fused Transformer decoder STACK (+ output projection): one pallas_call,
# grid = (batch, layer); logits written on the last layer step.
# ----------------------------------------------------------------------------

def _dec_stack_kernel(x_ref, mem_ref, kp_ref,
                      sa_wqkv, sa_bqkv, sa_wo, sa_bo,
                      ca_wqkv, ca_bqkv, ca_wo, ca_bo,
                      lnw, lnb, w1, b1, w2, b2,
                      wout, bout,
                      logits_ref, act_ref, *, n_head):
    l = pl.program_id(1)

    @pl.when(l == 0)
    def _():
        act_ref[...] = x_ref[0]                     # load decoder embeddings once

    x = act_ref[...]                                # (St, D)
    mem = mem_ref[0, 0]                             # (Ss, D)  encoder layer-l output
    St = x.shape[0]

    # Causal mask built in-kernel; key-padding row (1, St) broadcast over queries.
    row = lax.broadcasted_iota(jnp.int32, (St, St), 0)
    col = lax.broadcasted_iota(jnp.int32, (St, St), 1)
    causal = jnp.where(col > row, NEG_INF, 0.0).astype(jnp.float32)
    self_mask = causal + kp_ref[0]                  # (St, St)

    sa = _mha(x, x, sa_wqkv[0], sa_bqkv[0], sa_wo[0], sa_bo[0],
              self_mask, n_head, fused_qkv=True)
    h = _layernorm(x + sa, lnw[0, 0:1], lnb[0, 0:1])

    ca = _mha(h, mem, ca_wqkv[0], ca_bqkv[0], ca_wo[0], ca_bo[0],
              None, n_head, fused_qkv=False)
    h = _layernorm(h + ca, lnw[0, 1:2], lnb[0, 1:2])

    ff = jnp.maximum(_mm(h, w1[0]) + b1[0], 0.0)
    ff = _mm(ff, w2[0]) + b2[0]
    y = _layernorm(h + ff, lnw[0, 2:3], lnb[0, 2:3])

    act_ref[...] = y

    @pl.when(l == pl.num_programs(1) - 1)           # fused, lane-padded vocab projection
    def _():
        logits_ref[0] = _mm(y, wout[...]) + bout[...]


def transformer_decoder_stack(x, memory, key_pad, dp, out_w_pad, out_b_pad, n_head):
    B, St, D = x.shape
    L, _, Ss, _ = memory.shape
    F = dp["w1"].shape[2]
    Vp = out_w_pad.shape[1]
    lw = lambda shape: pl.BlockSpec(shape, lambda b, l: (l,) + (0,) * (len(shape) - 1))
    kernel = functools.partial(_dec_stack_kernel, n_head=n_head)

    return pl.pallas_call(
        kernel,
        out_shape=jax.ShapeDtypeStruct((B, St, Vp), jnp.float32),
        grid=(B, L),
        in_specs=[
            pl.BlockSpec((1, St, D), lambda b, l: (b, 0, 0)),        # decoder embeddings
            pl.BlockSpec((1, 1, Ss, D), lambda b, l: (l, b, 0, 0)),  # encoder memory[l]
            pl.BlockSpec((1, 1, St), lambda b, l: (b, 0, 0)),        # key-padding row
            lw((1, D, 3 * D)), lw((1, 1, 3 * D)), lw((1, D, D)), lw((1, 1, D)),  # self-attn
            lw((1, D, 3 * D)), lw((1, 1, 3 * D)), lw((1, D, D)), lw((1, 1, D)),  # cross-attn
            lw((1, 3, D)), lw((1, 3, D)),                                        # LayerNorms
            lw((1, D, F)), lw((1, 1, F)), lw((1, F, D)), lw((1, 1, D)),          # FFN
            pl.BlockSpec((D, Vp), lambda b, l: (0, 0)),              # out proj (padded)
            pl.BlockSpec((1, Vp), lambda b, l: (0, 0)),
        ],
        out_specs=pl.BlockSpec((1, St, Vp), lambda b, l: (b, 0, 0)),
        scratch_shapes=[pltpu.VMEM((St, D), jnp.float32)],
        compiler_params=pltpu.CompilerParams(
            dimension_semantics=("parallel", "arbitrary")),
    )(x, memory, key_pad,
      dp["sa_wqkv"], dp["sa_bqkv"], dp["sa_wo"], dp["sa_bo"],
      dp["ca_wqkv"], dp["ca_bqkv"], dp["ca_wo"], dp["ca_bo"],
      dp["ln_w"], dp["ln_b"], dp["w1"], dp["b1"], dp["w2"], dp["b2"],
      out_w_pad, out_b_pad)


# ----------------------------------------------------------------------------
# Model composition (embedding gather + mask prep are plain-JAX glue)
# ----------------------------------------------------------------------------

def triple_embedding(ids, p):
    # token + learned positional + segment-type (all type-id 0) embeddings.
    B, S = ids.shape
    tok = p["tok"][ids]                                # (B, S, D) gather (glue)
    pos = p["pos"][jnp.arange(S)][None, :, :]          # (1, S, D)
    typ = p["typ"][0][None, None, :]                   # (1, 1, D)
    return (tok + pos + typ).astype(jnp.float32)


def dft_matrices(n):
    idx = jnp.arange(n, dtype=jnp.float32)
    ang = 2.0 * jnp.pi * jnp.outer(idx, idx) / n
    return jnp.cos(ang), jnp.sin(ang)


def ufnet_forward(params, src, tgt, *, n_head, tgt_pad_idx, tgt_vs):
    # additive key-padding mask for the decoder self-attention (B, 1, S_tgt)
    key_pad = jnp.where(tgt == tgt_pad_idx, NEG_INF, 0.0).astype(jnp.float32)[:, None, :]

    enc = triple_embedding(src, params["enc_emb"])
    dec = triple_embedding(tgt, params["dec_emb"])

    enc_outs = fnet_encoder_stack(enc, params["encoders"], params["dft_enc"])  # (L,B,S,D)
    logits_pad = transformer_decoder_stack(
        dec, enc_outs, key_pad, params["decoders"],
        params["out_w_pad"], params["out_b_pad"], n_head)

    return logits_pad[:, :, :tgt_vs]


# ----------------------------------------------------------------------------
# Parameter init directly in the fused-stack kernel layout (weights stacked on L)
# ----------------------------------------------------------------------------

def xavier(key, shape):
    fan_in, fan_out = shape[-2], shape[-1]
    bound = math.sqrt(6.0 / (fan_in + fan_out))
    return jax.random.uniform(key, shape, jnp.float32, -bound, bound)


def init_params(key, model_dim, n_head, dim_ff, num_layers, src_vs, tgt_vs,
                max_len, seq_len):
    D, F, L = model_dim, dim_ff, num_layers
    keys = iter(jax.random.split(key, 64))
    nk = lambda: next(keys)

    def embedding_block(vs):
        return {"tok": xavier(nk(), (vs, D)),
                "pos": xavier(nk(), (max_len, D)),
                "typ": xavier(nk(), (2, D))}

    encoders = {
        "ln_w": jnp.ones((L, 2, D), jnp.float32),
        "ln_b": jnp.zeros((L, 2, D), jnp.float32),
        "w1": xavier(nk(), (L, D, F)), "b1": jnp.zeros((L, 1, F), jnp.float32),
        "w2": xavier(nk(), (L, F, D)), "b2": jnp.zeros((L, 1, D), jnp.float32),
    }

    decoders = {
        "sa_wqkv": xavier(nk(), (L, D, 3 * D)),
        "sa_bqkv": jnp.zeros((L, 1, 3 * D), jnp.float32),
        "sa_wo": xavier(nk(), (L, D, D)), "sa_bo": jnp.zeros((L, 1, D), jnp.float32),
        "ca_wqkv": xavier(nk(), (L, D, 3 * D)),
        "ca_bqkv": jnp.zeros((L, 1, 3 * D), jnp.float32),
        "ca_wo": xavier(nk(), (L, D, D)), "ca_bo": jnp.zeros((L, 1, D), jnp.float32),
        "ln_w": jnp.ones((L, 3, D), jnp.float32),
        "ln_b": jnp.zeros((L, 3, D), jnp.float32),
        "w1": xavier(nk(), (L, D, F)), "b1": jnp.zeros((L, 1, F), jnp.float32),
        "w2": xavier(nk(), (L, F, D)), "b2": jnp.zeros((L, 1, D), jnp.float32),
    }

    # DFT matrices, both sides pre-concatenated for single-MXU-pass contractions.
    cos_s, sin_s = dft_matrices(seq_len)
    cos_d, sin_d = dft_matrices(D)
    dft_enc = {"cos_sin_d": jnp.concatenate([cos_d, sin_d], axis=1),      # (D, 2D)
               "cos_negsin_s": jnp.concatenate([cos_s, -sin_s], axis=1)}  # (S, 2S)

    # Lane-padded output projection (multiple of 128 lanes -> unmasked full stores).
    out_w = xavier(nk(), (D, tgt_vs))
    v_pad = ((tgt_vs + 127) // 128) * 128
    out_w_pad = jnp.zeros((D, v_pad), jnp.float32).at[:, :tgt_vs].set(out_w)
    out_b_pad = jnp.zeros((1, v_pad), jnp.float32)

    return {"enc_emb": embedding_block(src_vs),
            "dec_emb": embedding_block(tgt_vs),
            "encoders": encoders,
            "decoders": decoders,
            "dft_enc": dft_enc,
            "out_w_pad": out_w_pad,
            "out_b_pad": out_b_pad}


# ----------------------------------------------------------------------------

if __name__ == "__main__":
    model_dim = 32
    n_head = 4
    dim_feedforward = 64
    num_layers = 2
    src_vs = 50
    tgt_vs = 40
    src_pad_idx = 0      # only relevant as nn.Embedding padding_idx; unused in forward
    tgt_pad_idx = 0

    B = 2
    S_src = 8
    S_tgt = 8

    key = jax.random.PRNGKey(0)
    k_par, k_src, k_tgt = jax.random.split(key, 3)

    params = init_params(k_par, model_dim, n_head, dim_feedforward, num_layers,
                         src_vs, tgt_vs, max_len=max(S_src, S_tgt), seq_len=S_src)

    src = jax.random.randint(k_src, (B, S_src), 1, src_vs, dtype=jnp.int32)
    tgt = jax.random.randint(k_tgt, (B, S_tgt), 1, tgt_vs, dtype=jnp.int32)
    # make the last tgt token of the second sequence a padding token
    tgt = tgt.at[1, -1].set(tgt_pad_idx)

    fwd = jax.jit(functools.partial(ufnet_forward, n_head=n_head,
                                    tgt_pad_idx=tgt_pad_idx, tgt_vs=tgt_vs))
    logits = fwd(params, src, tgt)
    jax.block_until_ready(logits)

    assert logits.shape == (B, S_tgt, tgt_vs), logits.shape
    assert bool(jnp.all(jnp.isfinite(logits)))
    print("KERNEL_OK")
</pallas_src>

<mosaic_0001>
module attributes {stable_mosaic.version = 11 : i64} {
  func.func @_enc_stack_kernel(%arg0: i32, %arg1: i32, %arg2: memref<1x8x32xf32, #tpu.memory_space<vmem>>, %arg3: memref<32x64xf32, #tpu.memory_space<vmem>>, %arg4: memref<8x16xf32, #tpu.memory_space<vmem>>, %arg5: memref<1x2x32xf32, #tpu.memory_space<vmem>>, %arg6: memref<1x2x32xf32, #tpu.memory_space<vmem>>, %arg7: memref<1x32x64xf32, #tpu.memory_space<vmem>>, %arg8: memref<1x1x64xf32, #tpu.memory_space<vmem>>, %arg9: memref<1x64x32xf32, #tpu.memory_space<vmem>>, %arg10: memref<1x1x32xf32, #tpu.memory_space<vmem>>, %arg11: memref<1x1x8x32xf32, #tpu.memory_space<vmem>>, %arg12: memref<8x32xf32, #tpu.memory_space<vmem>>) attributes {dimension_semantics = [#tpu.dimension_semantics<parallel>, #tpu.dimension_semantics<arbitrary>], iteration_bounds = array<i64: 2, 2>, scalar_prefetch = 0 : i64, scratch_operands = 1 : i64, tpu.core_type = #tpu.core_type<tc>, window_params = [{transform_indices = @transform_0, window_bounds = array<i64: 1, 8, 32>}, {pipeline_mode = #tpu.pipeline_mode<synchronous>, transform_indices = @transform_1, window_bounds = array<i64: 32, 64>}, {pipeline_mode = #tpu.pipeline_mode<synchronous>, transform_indices = @transform_2, window_bounds = array<i64: 8, 16>}, {transform_indices = @transform_3, window_bounds = array<i64: 1, 2, 32>}, {transform_indices = @transform_4, window_bounds = array<i64: 1, 2, 32>}, {transform_indices = @transform_5, window_bounds = array<i64: 1, 32, 64>}, {transform_indices = @transform_6, window_bounds = array<i64: 1, 1, 64>}, {transform_indices = @transform_7, window_bounds = array<i64: 1, 64, 32>}, {transform_indices = @transform_8, window_bounds = array<i64: 1, 1, 32>}, {transform_indices = @transform_9, window_bounds = array<i64: 1, 1, 8, 32>}]} {
    %c0_i32 = arith.constant 0 : i32
    %0 = arith.cmpi eq, %arg1, %c0_i32 : i32
    %1 = arith.extui %0 : i1 to i32
    %c0_i32_0 = arith.constant 0 : i32
    %2 = arith.cmpi ne, %1, %c0_i32_0 : i32
    scf.if %2 {
      %c0_49 = arith.constant 0 : index
      %c0_50 = arith.constant 0 : index
      %c0_51 = arith.constant 0 : index
      %85 = vector.load %arg2[%c0_49, %c0_50, %c0_51] : memref<1x8x32xf32, #tpu.memory_space<vmem>>, vector<1x8x32xf32>
      %86 = vector.shape_cast %85 : vector<1x8x32xf32> to vector<8x32xf32>
      %c0_52 = arith.constant 0 : index
      %c0_53 = arith.constant 0 : index
      %87 = vector.load %arg12[%c0_52, %c0_53] : memref<8x32xf32, #tpu.memory_space<vmem>>, vector<8x32xf32>
      tpu.vector_store %arg12[%c0_52, %c0_53], %86 {strides = array<i32>} : memref<8x32xf32, #tpu.memory_space<vmem>>, vector<8x32xf32>,
    } else {
    }
    %c0 = arith.constant 0 : index
    %c0_1 = arith.constant 0 : index
    %3 = vector.load %arg12[%c0, %c0_1] : memref<8x32xf32, #tpu.memory_space<vmem>>, vector<8x32xf32>
    %c0_2 = arith.constant 0 : index
    %c0_3 = arith.constant 0 : index
    %4 = vector.load %arg3[%c0_2, %c0_3] : memref<32x64xf32, #tpu.memory_space<vmem>>, vector<32x64xf32>
    %cst = arith.constant dense<0.000000e+00> : vector<8x64xf32>
    %5 = tpu.matmul %3, %4, %cst {dimension_numbers = #tpu.dot_dimension_numbers<[1], [0], [0], [1], [0, 0, 1, 1], [], []>} : vector<8x32xf32>, vector<32x64xf32>, vector<8x64xf32> -> vector<8x64xf32>
    %6 = vector.extract_strided_slice %5 {offsets = [0, 0], sizes = [8, 32], strides = [1, 1]} : vector<8x64xf32> to vector<8x32xf32>
    %7 = vector.extract_strided_slice %5 {offsets = [0, 32], sizes = [8, 32], strides = [1, 1]} : vector<8x64xf32> to vector<8x32xf32>
    %8 = tpu.concatenate %6, %7 in 0 : vector<8x32xf32>, vector<8x32xf32> -> vector<16x32xf32>
    %c0_4 = arith.constant 0 : index
    %c0_5 = arith.constant 0 : index
    %9 = vector.load %arg4[%c0_4, %c0_5] : memref<8x16xf32, #tpu.memory_space<vmem>>, vector<8x16xf32>
    %cst_6 = arith.constant dense<0.000000e+00> : vector<8x32xf32>
    %10 = tpu.matmul %9, %8, %cst_6 {dimension_numbers = #tpu.dot_dimension_numbers<[1], [0], [0], [1], [0, 0, 1, 1], [], []>} : vector<8x16xf32>, vector<16x32xf32>, vector<8x32xf32> -> vector<8x32xf32>
    %11 = arith.addf %3, %10 : vector<8x32xf32>
    %c0_7 = arith.constant 0 : index
    %c0_8 = arith.constant 0 : index
    %c0_9 = arith.constant 0 : index
    %12 = vector.load %arg5[%c0_7, %c0_8, %c0_9] : memref<1x2x32xf32, #tpu.memory_space<vmem>>, vector<1x1x32xf32>
    %13 = vector.shape_cast %12 : vector<1x1x32xf32> to vector<1x32xf32>
    %c0_10 = arith.constant 0 : index
    %c0_11 = arith.constant 0 : index
    %c0_12 = arith.constant 0 : index
    %14 = vector.load %arg6[%c0_10, %c0_11, %c0_12] : memref<1x2x32xf32, #tpu.memory_space<vmem>>, vector<1x1x32xf32>
    %15 = vector.shape_cast %14 : vector<1x1x32xf32> to vector<1x32xf32>
    %cst_13 = arith.constant dense<0.000000e+00> : vector<8xf32>
    %16 = vector.multi_reduction <add>, %11, %cst_13 [1] : vector<8x32xf32> to vector<8xf32>
    %17 = vector.shape_cast %16 : vector<8xf32> to vector<8x1xf32>
    %cst_14 = arith.constant 3.200000e+01 : f32
    %18 = vector.broadcast %cst_14 : f32 to vector<8x1xf32>
    %19 = arith.divf %17, %18 : vector<8x1xf32>
    %20 = vector.broadcast %19 : vector<8x1xf32> to vector<8x32xf32>
    %21 = arith.subf %11, %20 : vector<8x32xf32>
    %22 = arith.mulf %21, %21 : vector<8x32xf32>
    %cst_15 = arith.constant dense<0.000000e+00> : vector<8xf32>
    %23 = vector.multi_reduction <add>, %22, %cst_15 [1] : vector<8x32xf32> to vector<8xf32>
    %24 = vector.shape_cast %23 : vector<8xf32> to vector<8x1xf32>
    %cst_16 = arith.constant 3.200000e+01 : f32
    %25 = vector.broadcast %cst_16 : f32 to vector<8x1xf32>
    %26 = arith.divf %24, %25 : vector<8x1xf32>
    %27 = vector.broadcast %19 : vector<8x1xf32> to vector<8x32xf32>
    %28 = arith.subf %11, %27 : vector<8x32xf32>
    %cst_17 = arith.constant 9.99999974E-6 : f32
    %29 = vector.broadcast %cst_17 : f32 to vector<8x1xf32>
    %30 = arith.addf %26, %29 : vector<8x1xf32>
    %31 = math.rsqrt %30 : vector<8x1xf32>
    %32 = vector.broadcast %31 : vector<8x1xf32> to vector<8x32xf32>
    %33 = arith.mulf %28, %32 : vector<8x32xf32>
    %34 = vector.broadcast %13 : vector<1x32xf32> to vector<8x32xf32>
    %35 = arith.mulf %33, %34 : vector<8x32xf32>
    %36 = vector.broadcast %15 : vector<1x32xf32> to vector<8x32xf32>
    %37 = arith.addf %35, %36 : vector<8x32xf32>
    %c0_18 = arith.constant 0 : index
    %c0_19 = arith.constant 0 : index
    %c0_20 = arith.constant 0 : index
    %38 = vector.load %arg7[%c0_18, %c0_19, %c0_20] : memref<1x32x64xf32, #tpu.memory_space<vmem>>, vector<1x32x64xf32>
    %39 = vector.shape_cast %38 : vector<1x32x64xf32> to vector<32x64xf32>
    %cst_21 = arith.constant dense<0.000000e+00> : vector<8x64xf32>
    %40 = tpu.matmul %37, %39, %cst_21 {dimension_numbers = #tpu.dot_dimension_numbers<[1], [0], [0], [1], [0, 0, 1, 1], [], []>} : vector<8x32xf32>, vector<32x64xf32>, vector<8x64xf32> -> vector<8x64xf32>
    %c0_22 = arith.constant 0 : index
    %c0_23 = arith.constant 0 : index
    %c0_24 = arith.constant 0 : index
    %41 = vector.load %arg8[%c0_22, %c0_23, %c0_24] : memref<1x1x64xf32, #tpu.memory_space<vmem>>, vector<1x1x64xf32>
    %42 = vector.shape_cast %41 : vector<1x1x64xf32> to vector<1x64xf32>
    %43 = vector.broadcast %42 : vector<1x64xf32> to vector<8x64xf32>
    %44 = arith.addf %40, %43 : vector<8x64xf32>
    %cst_25 = arith.constant 0.000000e+00 : f32
    %45 = vector.broadcast %cst_25 : f32 to vector<8x64xf32>
    %46 = arith.maximumf %44, %45 : vector<8x64xf32>
    %c0_26 = arith.constant 0 : index
    %c0_27 = arith.constant 0 : index
    %c0_28 = arith.constant 0 : index
    %47 = vector.load %arg9[%c0_26, %c0_27, %c0_28] : memref<1x64x32xf32, #tpu.memory_space<vmem>>, vector<1x64x32xf32>
    %48 = vector.shape_cast %47 : vector<1x64x32xf32> to vector<64x32xf32>
    %cst_29 = arith.constant dense<0.000000e+00> : vector<8x32xf32>
    %49 = tpu.matmul %46, %48, %cst_29 {dimension_numbers = #tpu.dot_dimension_numbers<[1], [0], [0], [1], [0, 0, 1, 1], [], []>} : vector<8x64xf32>, vector<64x32xf32>, vector<8x32xf32> -> vector<8x32xf32>
    %c0_30 = arith.constant 0 : index
    %c0_31 = arith.constant 0 : index
    %c0_32 = arith.constant 0 : index
    %50 = vector.load %arg10[%c0_30, %c0_31, %c0_32] : memref<1x1x32xf32, #tpu.memory_space<vmem>>, vector<1x1x32xf32>
    %51 = vector.shape_cast %50 : vector<1x1x32xf32> to vector<1x32xf32>
    %52 = vector.broadcast %51 : vector<1x32xf32> to vector<8x32xf32>
    %53 = arith.addf %49, %52 : vector<8x32xf32>
    %54 = arith.addf %37, %53 : vector<8x32xf32>
    %c0_33 = arith.constant 0 : index
    %c1 = arith.constant 1 : index
    %c0_34 = arith.constant 0 : index
    %55 = vector.load %arg5[%c0_33, %c1, %c0_34] : memref<1x2x32xf32, #tpu.memory_space<vmem>>, vector<1x1x32xf32>
    %56 = vector.shape_cast %55 : vector<1x1x32xf32> to vector<1x32xf32>
    %c0_35 = arith.constant 0 : index
    %c1_36 = arith.constant 1 : index
    %c0_37 = arith.constant 0 : index
    %57 = vector.load %arg6[%c0_35, %c1_36, %c0_37] : memref<1x2x32xf32, #tpu.memory_space<vmem>>, vector<1x1x32xf32>
    %58 = vector.shape_cast %57 : vector<1x1x32xf32> to vector<1x32xf32>
    %cst_38 = arith.constant dense<0.000000e+00> : vector<8xf32>
    %59 = vector.multi_reduction <add>, %54, %cst_38 [1] : vector<8x32xf32> to vector<8xf32>
    %60 = vector.shape_cast %59 : vector<8xf32> to vector<8x1xf32>
    %cst_39 = arith.constant 3.200000e+01 : f32
    %61 = vector.broadcast %cst_39 : f32 to vector<8x1xf32>
    %62 = arith.divf %60, %61 : vector<8x1xf32>
    %63 = vector.broadcast %62 : vector<8x1xf32> to vector<8x32xf32>
    %64 = arith.subf %54, %63 : vector<8x32xf32>
    %65 = arith.mulf %64, %64 : vector<8x32xf32>
    %cst_40 = arith.constant dense<0.000000e+00> : vector<8xf32>
    %66 = vector.multi_reduction <add>, %65, %cst_40 [1] : vector<8x32xf32> to vector<8xf32>
    %67 = vector.shape_cast %66 : vector<8xf32> to vector<8x1xf32>
    %cst_41 = arith.constant 3.200000e+01 : f32
    %68 = vector.broadcast %cst_41 : f32 to vector<8x1xf32>
    %69 = arith.divf %67, %68 : vector<8x1xf32>
    %70 = vector.broadcast %62 : vector<8x1xf32> to vector<8x32xf32>
    %71 = arith.subf %54, %70 : vector<8x32xf32>
    %cst_42 = arith.constant 9.99999974E-6 : f32
    %72 = vector.broadcast %cst_42 : f32 to vector<8x1xf32>
    %73 = arith.addf %69, %72 : vector<8x1xf32>
    %74 = math.rsqrt %73 : vector<8x1xf32>
    %75 = vector.broadcast %74 : vector<8x1xf32> to vector<8x32xf32>
    %76 = arith.mulf %71, %75 : vector<8x32xf32>
    %77 = vector.broadcast %56 : vector<1x32xf32> to vector<8x32xf32>
    %78 = arith.mulf %76, %77 : vector<8x32xf32>
    %79 = vector.broadcast %58 : vector<1x32xf32> to vector<8x32xf32>
    %80 = arith.addf %78, %79 : vector<8x32xf32>
    %c0_43 = arith.constant 0 : index
    %c0_44 = arith.constant 0 : index
    %81 = vector.load %arg12[%c0_43, %c0_44] : memref<8x32xf32, #tpu.memory_space<vmem>>, vector<8x32xf32>
    tpu.vector_store %arg12[%c0_43, %c0_44], %80 {strides = array<i32>} : memref<8x32xf32, #tpu.memory_space<vmem>>, vector<8x32xf32>,
    %c0_45 = arith.constant 0 : index
    %c0_46 = arith.constant 0 : index
    %c0_47 = arith.constant 0 : index
    %c0_48 = arith.constant 0 : index
    %82 = vector.load %arg11[%c0_45, %c0_46, %c0_47, %c0_48] : memref<1x1x8x32xf32, #tpu.memory_space<vmem>>, vector<1x1x8x32xf32>
    %83 = vector.shape_cast %82 : vector<1x1x8x32xf32> to vector<8x32xf32>
    %84 = vector.shape_cast %80 : vector<8x32xf32> to vector<1x1x8x32xf32>
    tpu.vector_store %arg11[%c0_45, %c0_46, %c0_47, %c0_48], %84 {strides = array<i32>} : memref<1x1x8x32xf32, #tpu.memory_space<vmem>>, vector<1x1x8x32xf32>,
    return
  }
  func.func @transform_0(%arg0: i32, %arg1: i32) -> (i32, i32, i32) {
    %c0_i32 = arith.constant 0 : i32
    %c0_i32_0 = arith.constant 0 : i32
    %c0_i32_1 = arith.constant 0 : i32
    return %arg0, %c0_i32, %c0_i32_0 : i32, i32, i32
  }
  func.func @transform_1(%arg0: i32, %arg1: i32) -> (i32, i32) {
    %c0_i32 = arith.constant 0 : i32
    %c0_i32_0 = arith.constant 0 : i32
    %c0_i32_1 = arith.constant 0 : i32
    return %c0_i32, %c0_i32_0 : i32, i32
  }
  func.func @transform_2(%arg0: i32, %arg1: i32) -> (i32, i32) {
    %c0_i32 = arith.constant 0 : i32
    %c0_i32_0 = arith.constant 0 : i32
    %c0_i32_1 = arith.constant 0 : i32
    return %c0_i32, %c0_i32_0 : i32, i32
  }
  func.func @transform_3(%arg0: i32, %arg1: i32) -> (i32, i32, i32) {
    %c0_i32 = arith.constant 0 : i32
    %c0_i32_0 = arith.constant 0 : i32
    %c0_i32_1 = arith.constant 0 : i32
    return %arg1, %c0_i32, %c0_i32_0 : i32, i32, i32
  }
  func.func @transform_4(%arg0: i32, %arg1: i32) -> (i32, i32, i32) {
    %c0_i32 = arith.constant 0 : i32
    %c0_i32_0 = arith.constant 0 : i32
    %c0_i32_1 = arith.constant 0 : i32
    return %arg1, %c0_i32, %c0_i32_0 : i32, i32, i32
  }
  func.func @transform_5(%arg0: i32, %arg1: i32) -> (i32, i32, i32) {
    %c0_i32 = arith.constant 0 : i32
    %c0_i32_0 = arith.constant 0 : i32
    %c0_i32_1 = arith.constant 0 : i32
    return %arg1, %c0_i32, %c0_i32_0 : i32, i32, i32
  }
  func.func @transform_6(%arg0: i32, %arg1: i32) -> (i32, i32, i32) {
    %c0_i32 = arith.constant 0 : i32
    %c0_i32_0 = arith.constant 0 : i32
    %c0_i32_1 = arith.constant 0 : i32
    return %arg1, %c0_i32, %c0_i32_0 : i32, i32, i32
  }
  func.func @transform_7(%arg0: i32, %arg1: i32) -> (i32, i32, i32) {
    %c0_i32 = arith.constant 0 : i32
    %c0_i32_0 = arith.constant 0 : i32
    %c0_i32_1 = arith.constant 0 : i32
    return %arg1, %c0_i32, %c0_i32_0 : i32, i32, i32
  }
  func.func @transform_8(%arg0: i32, %arg1: i32) -> (i32, i32, i32) {
    %c0_i32 = arith.constant 0 : i32
    %c0_i32_0 = arith.constant 0 : i32
    %c0_i32_1 = arith.constant 0 : i32
    return %arg1, %c0_i32, %c0_i32_0 : i32, i32, i32
  }
  func.func @transform_9(%arg0: i32, %arg1: i32) -> (i32, i32, i32, i32) {
    %c0_i32 = arith.constant 0 : i32
    %c0_i32_0 = arith.constant 0 : i32
    %c0_i32_1 = arith.constant 0 : i32
    return %arg1, %arg0, %c0_i32, %c0_i32_0 : i32, i32, i32, i32
  }
}

module attributes {stable_mosaic.version = 11 : i64} {
  func.func @_dec_stack_kernel(%arg0: i32, %arg1: i32, %arg2: memref<1x8x32xf32, #tpu.memory_space<vmem>>, %arg3: memref<1x1x8x32xf32, #tpu.memory_space<vmem>>, %arg4: memref<1x1x8xf32, #tpu.memory_space<vmem>>, %arg5: memref<1x32x96xf32, #tpu.memory_space<vmem>>, %arg6: memref<1x1x96xf32, #tpu.memory_space<vmem>>, %arg7: memref<1x32x32xf32, #tpu.memory_space<vmem>>, %arg8: memref<1x1x32xf32, #tpu.memory_space<vmem>>, %arg9: memref<1x32x96xf32, #tpu.memory_space<vmem>>, %arg10: memref<1x1x96xf32, #tpu.memory_space<vmem>>, %arg11: memref<1x32x32xf32, #tpu.memory_space<vmem>>, %arg12: memref<1x1x32xf32, #tpu.memory_space<vmem>>, %arg13: memref<1x3x32xf32, #tpu.memory_space<vmem>>, %arg14: memref<1x3x32xf32, #tpu.memory_space<vmem>>, %arg15: memref<1x32x64xf32, #tpu.memory_space<vmem>>, %arg16: memref<1x1x64xf32, #tpu.memory_space<vmem>>, %arg17: memref<1x64x32xf32, #tpu.memory_space<vmem>>, %arg18: memref<1x1x32xf32, #tpu.memory_space<vmem>>, %arg19: memref<32x128xf32, #tpu.memory_space<vmem>>, %arg20: memref<1x128xf32, #tpu.memory_space<vmem>>, %arg21: memref<1x8x128xf32, #tpu.memory_space<vmem>>, %arg22: memref<8x32xf32, #tpu.memory_space<vmem>>) attributes {dimension_semantics = [#tpu.dimension_semantics<parallel>, #tpu.dimension_semantics<arbitrary>], iteration_bounds = array<i64: 2, 2>, scalar_prefetch = 0 : i64, scratch_operands = 1 : i64, tpu.core_type = #tpu.core_type<tc>, window_params = [{transform_indices = @transform_0, window_bounds = array<i64: 1, 8, 32>}, {transform_indices = @transform_1, window_bounds = array<i64: 1, 1, 8, 32>}, {transform_indices = @transform_2, window_bounds = array<i64: 1, 1, 8>}, {transform_indices = @transform_3, window_bounds = array<i64: 1, 32, 96>}, {transform_indices = @transform_4, window_bounds = array<i64: 1, 1, 96>}, {transform_indices = @transform_5, window_bounds = array<i64: 1, 32, 32>}, {transform_indices = @transform_6, window_bounds = array<i64: 1, 1, 32>}, {transform_indices = @transform_7, window_bounds = array<i64: 1, 32, 96>}, {transform_indices = @transform_8, window_bounds = array<i64: 1, 1, 96>}, {transform_indices = @transform_9, window_bounds = array<i64: 1, 32, 32>}, {transform_indices = @transform_10, window_bounds = array<i64: 1, 1, 32>}, {transform_indices = @transform_11, window_bounds = array<i64: 1, 3, 32>}, {transform_indices = @transform_12, window_bounds = array<i64: 1, 3, 32>}, {transform_indices = @transform_13, window_bounds = array<i64: 1, 32, 64>}, {transform_indices = @transform_14, window_bounds = array<i64: 1, 1, 64>}, {transform_indices = @transform_15, window_bounds = array<i64: 1, 64, 32>}, {transform_indices = @transform_16, window_bounds = array<i64: 1, 1, 32>}, {pipeline_mode = #tpu.pipeline_mode<synchronous>, transform_indices = @transform_17, window_bounds = array<i64: 32, 128>}, {pipeline_mode = #tpu.pipeline_mode<synchronous>, transform_indices = @transform_18, window_bounds = array<i64: 1, 128>}, {transform_indices = @transform_19, window_bounds = array<i64: 1, 8, 128>}]} {
    %c0_i32 = arith.constant 0 : i32
    %0 = arith.cmpi eq, %arg1, %c0_i32 : i32
    %1 = arith.extui %0 : i1 to i32
    %c0_i32_0 = arith.constant 0 : i32
    %2 = arith.cmpi ne, %1, %c0_i32_0 : i32
    scf.if %2 {
      %c0_128 = arith.constant 0 : index
      %c0_129 = arith.constant 0 : index
      %c0_130 = arith.constant 0 : index
      %299 = vector.load %arg2[%c0_128, %c0_129, %c0_130] : memref<1x8x32xf32, #tpu.memory_space<vmem>>, vector<1x8x32xf32>
      %300 = vector.shape_cast %299 : vector<1x8x32xf32> to vector<8x32xf32>
      %c0_131 = arith.constant 0 : index
      %c0_132 = arith.constant 0 : index
      %301 = vector.load %arg22[%c0_131, %c0_132] : memref<8x32xf32, #tpu.memory_space<vmem>>, vector<8x32xf32>
      tpu.vector_store %arg22[%c0_131, %c0_132], %300 {strides = array<i32>} : memref<8x32xf32, #tpu.memory_space<vmem>>, vector<8x32xf32>,
    } else {
    }
    %c0 = arith.constant 0 : index
    %c0_1 = arith.constant 0 : index
    %3 = vector.load %arg22[%c0, %c0_1] : memref<8x32xf32, #tpu.memory_space<vmem>>, vector<8x32xf32>
    %c0_2 = arith.constant 0 : index
    %c0_3 = arith.constant 0 : index
    %c0_4 = arith.constant 0 : index
    %c0_5 = arith.constant 0 : index
    %4 = vector.load %arg3[%c0_2, %c0_3, %c0_4, %c0_5] : memref<1x1x8x32xf32, #tpu.memory_space<vmem>>, vector<1x1x8x32xf32>
    %5 = vector.shape_cast %4 : vector<1x1x8x32xf32> to vector<8x32xf32>
    %6 = tpu.iota {dimensions = array<i32: 0>} : vector<8x8xi32>
    %7 = tpu.iota {dimensions = array<i32: 1>} : vector<8x8xi32>
    %8 = arith.cmpi sgt, %7, %6 : vector<8x8xi32>
    %cst = arith.constant -1.000000e+09 : f32
    %cst_6 = arith.constant 0.000000e+00 : f32
    %9 = vector.broadcast %cst : f32 to vector<8x8xf32>
    %10 = vector.broadcast %cst_6 : f32 to vector<8x8xf32>
    %11 = arith.select %8, %9, %10 : vector<8x8xi1>, vector<8x8xf32>
    %c0_7 = arith.constant 0 : index
    %c0_8 = arith.constant 0 : index
    %c0_9 = arith.constant 0 : index
    %12 = vector.load %arg4[%c0_7, %c0_8, %c0_9] : memref<1x1x8xf32, #tpu.memory_space<vmem>>, vector<1x1x8xf32>
    %13 = vector.shape_cast %12 : vector<1x1x8xf32> to vector<1x8xf32>
    %14 = vector.broadcast %13 : vector<1x8xf32> to vector<8x8xf32>
    %15 = arith.addf %11, %14 : vector<8x8xf32>
    %c0_10 = arith.constant 0 : index
    %c0_11 = arith.constant 0 : index
    %c0_12 = arith.constant 0 : index
    %16 = vector.load %arg5[%c0_10, %c0_11, %c0_12] : memref<1x32x96xf32, #tpu.memory_space<vmem>>, vector<1x32x96xf32>
    %17 = vector.shape_cast %16 : vector<1x32x96xf32> to vector<32x96xf32>
    %c0_13 = arith.constant 0 : index
    %c0_14 = arith.constant 0 : index
    %c0_15 = arith.constant 0 : index
    %18 = vector.load %arg6[%c0_13, %c0_14, %c0_15] : memref<1x1x96xf32, #tpu.memory_space<vmem>>, vector<1x1x96xf32>
    %19 = vector.shape_cast %18 : vector<1x1x96xf32> to vector<1x96xf32>
    %c0_16 = arith.constant 0 : index
    %c0_17 = arith.constant 0 : index
    %c0_18 = arith.constant 0 : index
    %20 = vector.load %arg7[%c0_16, %c0_17, %c0_18] : memref<1x32x32xf32, #tpu.memory_space<vmem>>, vector<1x32x32xf32>
    %21 = vector.shape_cast %20 : vector<1x32x32xf32> to vector<32x32xf32>
    %c0_19 = arith.constant 0 : index
    %c0_20 = arith.constant 0 : index
    %c0_21 = arith.constant 0 : index
    %22 = vector.load %arg8[%c0_19, %c0_20, %c0_21] : memref<1x1x32xf32, #tpu.memory_space<vmem>>, vector<1x1x32xf32>
    %23 = vector.shape_cast %22 : vector<1x1x32xf32> to vector<1x32xf32>
    %cst_22 = arith.constant dense<0.000000e+00> : vector<8x96xf32>
    %24 = tpu.matmul %3, %17, %cst_22 {dimension_numbers = #tpu.dot_dimension_numbers<[1], [0], [0], [1], [0, 0, 1, 1], [], []>} : vector<8x32xf32>, vector<32x96xf32>, vector<8x96xf32> -> vector<8x96xf32>
    %25 = vector.broadcast %19 : vector<1x96xf32> to vector<8x96xf32>
    %26 = arith.addf %24, %25 : vector<8x96xf32>
    %27 = vector.extract_strided_slice %26 {offsets = [0, 0], sizes = [8, 32], strides = [1, 1]} : vector<8x96xf32> to vector<8x32xf32>
    %28 = vector.extract_strided_slice %26 {offsets = [0, 32], sizes = [8, 32], strides = [1, 1]} : vector<8x96xf32> to vector<8x32xf32>
    %29 = vector.extract_strided_slice %26 {offsets = [0, 64], sizes = [8, 32], strides = [1, 1]} : vector<8x96xf32> to vector<8x32xf32>
    %30 = vector.extract_strided_slice %27 {offsets = [0, 0], sizes = [8, 8], strides = [1, 1]} : vector<8x32xf32> to vector<8x8xf32>
    %31 = vector.extract_strided_slice %28 {offsets = [0, 0], sizes = [8, 8], strides = [1, 1]} : vector<8x32xf32> to vector<8x8xf32>
    %32 = vector.extract_strided_slice %29 {offsets = [0, 0], sizes = [8, 8], strides = [1, 1]} : vector<8x32xf32> to vector<8x8xf32>
    %cst_23 = arith.constant dense<0.000000e+00> : vector<8x8xf32>
    %33 = tpu.matmul %30, %31, %cst_23 {dimension_numbers = #tpu.dot_dimension_numbers<[1], [1], [0], [0], [0, 0, 1, 0], [], []>} : vector<8x8xf32>, vector<8x8xf32>, vector<8x8xf32> -> vector<8x8xf32>
    %cst_24 = arith.constant 0.353553385 : f32
    %34 = vector.broadcast %cst_24 : f32 to vector<8x8xf32>
    %35 = arith.mulf %33, %34 : vector<8x8xf32>
    %36 = arith.addf %35, %15 : vector<8x8xf32>
    %cst_25 = arith.constant dense<0xFF800000> : vector<8xf32>
    %37 = vector.multi_reduction <maximumf>, %36, %cst_25 [1] : vector<8x8xf32> to vector<8xf32>
    %38 = vector.shape_cast %37 : vector<8xf32> to vector<8x1xf32>
    %39 = vector.broadcast %38 : vector<8x1xf32> to vector<8x8xf32>
    %40 = arith.subf %36, %39 : vector<8x8xf32>
    %41 = math.exp %40 : vector<8x8xf32>
    %cst_26 = arith.constant dense<0.000000e+00> : vector<8xf32>
    %42 = vector.multi_reduction <add>, %41, %cst_26 [1] : vector<8x8xf32> to vector<8xf32>
    %43 = vector.shape_cast %42 : vector<8xf32> to vector<8x1xf32>
    %44 = tpu.reciprocal %43 : vector<8x1xf32> -> vector<8x1xf32>
    %45 = vector.broadcast %44 : vector<8x1xf32> to vector<8x8xf32>
    %46 = arith.mulf %41, %45 : vector<8x8xf32>
    %cst_27 = arith.constant dense<0.000000e+00> : vector<8x8xf32>
    %47 = tpu.matmul %46, %32, %cst_27 {dimension_numbers = #tpu.dot_dimension_numbers<[1], [0], [0], [1], [0, 0, 1, 1], [], []>} : vector<8x8xf32>, vector<8x8xf32>, vector<8x8xf32> -> vector<8x8xf32>
    %48 = vector.extract_strided_slice %27 {offsets = [0, 8], sizes = [8, 8], strides = [1, 1]} : vector<8x32xf32> to vector<8x8xf32>
    %49 = vector.extract_strided_slice %28 {offsets = [0, 8], sizes = [8, 8], strides = [1, 1]} : vector<8x32xf32> to vector<8x8xf32>
    %50 = vector.extract_strided_slice %29 {offsets = [0, 8], sizes = [8, 8], strides = [1, 1]} : vector<8x32xf32> to vector<8x8xf32>
    %cst_28 = arith.constant dense<0.000000e+00> : vector<8x8xf32>
    %51 = tpu.matmul %48, %49, %cst_28 {dimension_numbers = #tpu.dot_dimension_numbers<[1], [1], [0], [0], [0, 0, 1, 0], [], []>} : vector<8x8xf32>, vector<8x8xf32>, vector<8x8xf32> -> vector<8x8xf32>
    %cst_29 = arith.constant 0.353553385 : f32
    %52 = vector.broadcast %cst_29 : f32 to vector<8x8xf32>
    %53 = arith.mulf %51, %52 : vector<8x8xf32>
    %54 = arith.addf %53, %15 : vector<8x8xf32>
    %cst_30 = arith.constant dense<0xFF800000> : vector<8xf32>
    %55 = vector.multi_reduction <maximumf>, %54, %cst_30 [1] : vector<8x8xf32> to vector<8xf32>
    %56 = vector.shape_cast %55 : vector<8xf32> to vector<8x1xf32>
    %57 = vector.broadcast %56 : vector<8x1xf32> to vector<8x8xf32>
    %58 = arith.subf %54, %57 : vector<8x8xf32>
    %59 = math.exp %58 : vector<8x8xf32>
    %cst_31 = arith.constant dense<0.000000e+00> : vector<8xf32>
    %60 = vector.multi_reduction <add>, %59, %cst_31 [1] : vector<8x8xf32> to vector<8xf32>
    %61 = vector.shape_cast %60 : vector<8xf32> to vector<8x1xf32>
    %62 = tpu.reciprocal %61 : vector<8x1xf32> -> vector<8x1xf32>
    %63 = vector.broadcast %62 : vector<8x1xf32> to vector<8x8xf32>
    %64 = arith.mulf %59, %63 : vector<8x8xf32>
    %cst_32 = arith.constant dense<0.000000e+00> : vector<8x8xf32>
    %65 = tpu.matmul %64, %50, %cst_32 {dimension_numbers = #tpu.dot_dimension_numbers<[1], [0], [0], [1], [0, 0, 1, 1], [], []>} : vector<8x8xf32>, vector<8x8xf32>, vector<8x8xf32> -> vector<8x8xf32>
    %66 = vector.extract_strided_slice %27 {offsets = [0, 16], sizes = [8, 8], strides = [1, 1]} : vector<8x32xf32> to vector<8x8xf32>
    %67 = vector.extract_strided_slice %28 {offsets = [0, 16], sizes = [8, 8], strides = [1, 1]} : vector<8x32xf32> to vector<8x8xf32>
    %68 = vector.extract_strided_slice %29 {offsets = [0, 16], sizes = [8, 8], strides = [1, 1]} : vector<8x32xf32> to vector<8x8xf32>
    %cst_33 = arith.constant dense<0.000000e+00> : vector<8x8xf32>
    %69 = tpu.matmul %66, %67, %cst_33 {dimension_numbers = #tpu.dot_dimension_numbers<[1], [1], [0], [0], [0, 0, 1, 0], [], []>} : vector<8x8xf32>, vector<8x8xf32>, vector<8x8xf32> -> vector<8x8xf32>
    %cst_34 = arith.constant 0.353553385 : f32
    %70 = vector.broadcast %cst_34 : f32 to vector<8x8xf32>
    %71 = arith.mulf %69, %70 : vector<8x8xf32>
    %72 = arith.addf %71, %15 : vector<8x8xf32>
    %cst_35 = arith.constant dense<0xFF800000> : vector<8xf32>
    %73 = vector.multi_reduction <maximumf>, %72, %cst_35 [1] : vector<8x8xf32> to vector<8xf32>
    %74 = vector.shape_cast %73 : vector<8xf32> to vector<8x1xf32>
    %75 = vector.broadcast %74 : vector<8x1xf32> to vector<8x8xf32>
    %76 = arith.subf %72, %75 : vector<8x8xf32>
    %77 = math.exp %76 : vector<8x8xf32>
    %cst_36 = arith.constant dense<0.000000e+00> : vector<8xf32>
    %78 = vector.multi_reduction <add>, %77, %cst_36 [1] : vector<8x8xf32> to vector<8xf32>
    %79 = vector.shape_cast %78 : vector<8xf32> to vector<8x1xf32>
    %80 = tpu.reciprocal %79 : vector<8x1xf32> -> vector<8x1xf32>
    %81 = vector.broadcast %80 : vector<8x1xf32> to vector<8x8xf32>
    %82 = arith.mulf %77, %81 : vector<8x8xf32>
    %cst_37 = arith.constant dense<0.000000e+00> : vector<8x8xf32>
    %83 = tpu.matmul %82, %68, %cst_37 {dimension_numbers = #tpu.dot_dimension_numbers<[1], [0], [0], [1], [0, 0, 1, 1], [], []>} : vector<8x8xf32>, vector<8x8xf32>, vector<8x8xf32> -> vector<8x8xf32>
    %84 = vector.extract_strided_slice %27 {offsets = [0, 24], sizes = [8, 8], strides = [1, 1]} : vector<8x32xf32> to vector<8x8xf32>
    %85 = vector.extract_strided_slice %28 {offsets = [0, 24], sizes = [8, 8], strides = [1, 1]} : vector<8x32xf32> to vector<8x8xf32>
    %86 = vector.extract_strided_slice %29 {offsets = [0, 24], sizes = [8, 8], strides = [1, 1]} : vector<8x32xf32> to vector<8x8xf32>
    %cst_38 = arith.constant dense<0.000000e+00> : vector<8x8xf32>
    %87 = tpu.matmul %84, %85, %cst_38 {dimension_numbers = #tpu.dot_dimension_numbers<[1], [1], [0], [0], [0, 0, 1, 0], [], []>} : vector<8x8xf32>, vector<8x8xf32>, vector<8x8xf32> -> vector<8x8xf32>
    %cst_39 = arith.constant 0.353553385 : f32
    %88 = vector.broadcast %cst_39 : f32 to vector<8x8xf32>
    %89 = arith.mulf %87, %88 : vector<8x8xf32>
    %90 = arith.addf %89, %15 : vector<8x8xf32>
    %cst_40 = arith.constant dense<0xFF800000> : vector<8xf32>
    %91 = vector.multi_reduction <maximumf>, %90, %cst_40 [1] : vector<8x8xf32> to vector<8xf32>
    %92 = vector.shape_cast %91 : vector<8xf32> to vector<8x1xf32>
    %93 = vector.broadcast %92 : vector<8x1xf32> to vector<8x8xf32>
    %94 = arith.subf %90, %93 : vector<8x8xf32>
    %95 = math.exp %94 : vector<8x8xf32>
    %cst_41 = arith.constant dense<0.000000e+00> : vector<8xf32>
    %96 = vector.multi_reduction <add>, %95, %cst_41 [1] : vector<8x8xf32> to vector<8xf32>
    %97 = vector.shape_cast %96 : vector<8xf32> to vector<8x1xf32>
    %98 = tpu.reciprocal %97 : vector<8x1xf32> -> vector<8x1xf32>
    %99 = vector.broadcast %98 : vector<8x1xf32> to vector<8x8xf32>
    %100 = arith.mulf %95, %99 : vector<8x8xf32>
    %cst_42 = arith.constant dense<0.000000e+00> : vector<8x8xf32>
    %101 = tpu.matmul %100, %86, %cst_42 {dimension_numbers = #tpu.dot_dimension_numbers<[1], [0], [0], [1], [0, 0, 1, 1], [], []>} : vector<8x8xf32>, vector<8x8xf32>, vector<8x8xf32> -> vector<8x8xf32>
    %102 = tpu.concatenate %47, %65, %83, %101 in 1 : vector<8x8xf32>, vector<8x8xf32>, vector<8x8xf32>, vector<8x8xf32> -> vector<8x32xf32>
    %cst_43 = arith.constant dense<0.000000e+00> : vector<8x32xf32>
    %103 = tpu.matmul %102, %21, %cst_43 {dimension_numbers = #tpu.dot_dimension_numbers<[1], [0], [0], [1], [0, 0, 1, 1], [], []>} : vector<8x32xf32>, vector<32x32xf32>, vector<8x32xf32> -> vector<8x32xf32>
    %104 = vector.broadcast %23 : vector<1x32xf32> to vector<8x32xf32>
    %105 = arith.addf %103, %104 : vector<8x32xf32>
    %106 = arith.addf %3, %105 : vector<8x32xf32>
    %c0_44 = arith.constant 0 : index
    %c0_45 = arith.constant 0 : index
    %c0_46 = arith.constant 0 : index
    %107 = vector.load %arg13[%c0_44, %c0_45, %c0_46] : memref<1x3x32xf32, #tpu.memory_space<vmem>>, vector<1x1x32xf32>
    %108 = vector.shape_cast %107 : vector<1x1x32xf32> to vector<1x32xf32>
    %c0_47 = arith.constant 0 : index
    %c0_48 = arith.constant 0 : index
    %c0_49 = arith.constant 0 : index
    %109 = vector.load %arg14[%c0_47, %c0_48, %c0_49] : memref<1x3x32xf32, #tpu.memory_space<vmem>>, vector<1x1x32xf32>
    %110 = vector.shape_cast %109 : vector<1x1x32xf32> to vector<1x32xf32>
    %cst_50 = arith.constant dense<0.000000e+00> : vector<8xf32>
    %111 = vector.multi_reduction <add>, %106, %cst_50 [1] : vector<8x32xf32> to vector<8xf32>
    %112 = vector.shape_cast %111 : vector<8xf32> to vector<8x1xf32>
    %cst_51 = arith.constant 3.200000e+01 : f32
    %113 = vector.broadcast %cst_51 : f32 to vector<8x1xf32>
    %114 = arith.divf %112, %113 : vector<8x1xf32>
    %115 = vector.broadcast %114 : vector<8x1xf32> to vector<8x32xf32>
    %116 = arith.subf %106, %115 : vector<8x32xf32>
    %117 = arith.mulf %116, %116 : vector<8x32xf32>
    %cst_52 = arith.constant dense<0.000000e+00> : vector<8xf32>
    %118 = vector.multi_reduction <add>, %117, %cst_52 [1] : vector<8x32xf32> to vector<8xf32>
    %119 = vector.shape_cast %118 : vector<8xf32> to vector<8x1xf32>
    %cst_53 = arith.constant 3.200000e+01 : f32
    %120 = vector.broadcast %cst_53 : f32 to vector<8x1xf32>
    %121 = arith.divf %119, %120 : vector<8x1xf32>
    %122 = vector.broadcast %114 : vector<8x1xf32> to vector<8x32xf32>
    %123 = arith.subf %106, %122 : vector<8x32xf32>
    %cst_54 = arith.constant 9.99999974E-6 : f32
    %124 = vector.broadcast %cst_54 : f32 to vector<8x1xf32>
    %125 = arith.addf %121, %124 : vector<8x1xf32>
    %126 = math.rsqrt %125 : vector<8x1xf32>
    %127 = vector.broadcast %126 : vector<8x1xf32> to vector<8x32xf32>
    %128 = arith.mulf %123, %127 : vector<8x32xf32>
    %129 = vector.broadcast %108 : vector<1x32xf32> to vector<8x32xf32>
    %130 = arith.mulf %128, %129 : vector<8x32xf32>
    %131 = vector.broadcast %110 : vector<1x32xf32> to vector<8x32xf32>
    %132 = arith.addf %130, %131 : vector<8x32xf32>
    %c0_55 = arith.constant 0 : index
    %c0_56 = arith.constant 0 : index
    %c0_57 = arith.constant 0 : index
    %133 = vector.load %arg9[%c0_55, %c0_56, %c0_57] : memref<1x32x96xf32, #tpu.memory_space<vmem>>, vector<1x32x96xf32>
    %134 = vector.shape_cast %133 : vector<1x32x96xf32> to vector<32x96xf32>
    %c0_58 = arith.constant 0 : index
    %c0_59 = arith.constant 0 : index
    %c0_60 = arith.constant 0 : index
    %135 = vector.load %arg10[%c0_58, %c0_59, %c0_60] : memref<1x1x96xf32, #tpu.memory_space<vmem>>, vector<1x1x96xf32>
    %136 = vector.shape_cast %135 : vector<1x1x96xf32> to vector<1x96xf32>
    %c0_61 = arith.constant 0 : index
    %c0_62 = arith.constant 0 : index
    %c0_63 = arith.constant 0 : index
    %137 = vector.load %arg11[%c0_61, %c0_62, %c0_63] : memref<1x32x32xf32, #tpu.memory_space<vmem>>, vector<1x32x32xf32>
    %138 = vector.shape_cast %137 : vector<1x32x32xf32> to vector<32x32xf32>
    %c0_64 = arith.constant 0 : index
    %c0_65 = arith.constant 0 : index
    %c0_66 = arith.constant 0 : index
    %139 = vector.load %arg12[%c0_64, %c0_65, %c0_66] : memref<1x1x32xf32, #tpu.memory_space<vmem>>, vector<1x1x32xf32>
    %140 = vector.shape_cast %139 : vector<1x1x32xf32> to vector<1x32xf32>
    %141 = vector.extract_strided_slice %134 {offsets = [0, 0], sizes = [32, 32], strides = [1, 1]} : vector<32x96xf32> to vector<32x32xf32>
    %cst_67 = arith.constant dense<0.000000e+00> : vector<8x32xf32>
    %142 = tpu.matmul %132, %141, %cst_67 {dimension_numbers = #tpu.dot_dimension_numbers<[1], [0], [0], [1], [0, 0, 1, 1], [], []>} : vector<8x32xf32>, vector<32x32xf32>, vector<8x32xf32> -> vector<8x32xf32>
    %143 = vector.extract_strided_slice %136 {offsets = [0, 0], sizes = [1, 32], strides = [1, 1]} : vector<1x96xf32> to vector<1x32xf32>
    %144 = vector.broadcast %143 : vector<1x32xf32> to vector<8x32xf32>
    %145 = arith.addf %142, %144 : vector<8x32xf32>
    %146 = vector.extract_strided_slice %134 {offsets = [0, 32], sizes = [32, 64], strides = [1, 1]} : vector<32x96xf32> to vector<32x64xf32>
    %cst_68 = arith.constant dense<0.000000e+00> : vector<8x64xf32>
    %147 = tpu.matmul %5, %146, %cst_68 {dimension_numbers = #tpu.dot_dimension_numbers<[1], [0], [0], [1], [0, 0, 1, 1], [], []>} : vector<8x32xf32>, vector<32x64xf32>, vector<8x64xf32> -> vector<8x64xf32>
    %148 = vector.extract_strided_slice %136 {offsets = [0, 32], sizes = [1, 64], strides = [1, 1]} : vector<1x96xf32> to vector<1x64xf32>
    %149 = vector.broadcast %148 : vector<1x64xf32> to vector<8x64xf32>
    %150 = arith.addf %147, %149 : vector<8x64xf32>
    %151 = vector.extract_strided_slice %150 {offsets = [0, 0], sizes = [8, 32], strides = [1, 1]} : vector<8x64xf32> to vector<8x32xf32>
    %152 = vector.extract_strided_slice %150 {offsets = [0, 32], sizes = [8, 32], strides = [1, 1]} : vector<8x64xf32> to vector<8x32xf32>
    %153 = vector.extract_strided_slice %145 {offsets = [0, 0], sizes = [8, 8], strides = [1, 1]} : vector<8x32xf32> to vector<8x8xf32>
    %154 = vector.extract_strided_slice %151 {offsets = [0, 0], sizes = [8, 8], strides = [1, 1]} : vector<8x32xf32> to vector<8x8xf32>
    %155 = vector.extract_strided_slice %152 {offsets = [0, 0], sizes = [8, 8], strides = [1, 1]} : vector<8x32xf32> to vector<8x8xf32>
    %cst_69 = arith.constant dense<0.000000e+00> : vector<8x8xf32>
    %156 = tpu.matmul %153, %154, %cst_69 {dimension_numbers = #tpu.dot_dimension_numbers<[1], [1], [0], [0], [0, 0, 1, 0], [], []>} : vector<8x8xf32>, vector<8x8xf32>, vector<8x8xf32> -> vector<8x8xf32>
    %cst_70 = arith.constant 0.353553385 : f32
    %157 = vector.broadcast %cst_70 : f32 to vector<8x8xf32>
    %158 = arith.mulf %156, %157 : vector<8x8xf32>
    %cst_71 = arith.constant dense<0xFF800000> : vector<8xf32>
    %159 = vector.multi_reduction <maximumf>, %158, %cst_71 [1] : vector<8x8xf32> to vector<8xf32>
    %160 = vector.shape_cast %159 : vector<8xf32> to vector<8x1xf32>
    %161 = vector.broadcast %160 : vector<8x1xf32> to vector<8x8xf32>
    %162 = arith.subf %158, %161 : vector<8x8xf32>
    %163 = math.exp %162 : vector<8x8xf32>
    %cst_72 = arith.constant dense<0.000000e+00> : vector<8xf32>
    %164 = vector.multi_reduction <add>, %163, %cst_72 [1] : vector<8x8xf32> to vector<8xf32>
    %165 = vector.shape_cast %164 : vector<8xf32> to vector<8x1xf32>
    %166 = tpu.reciprocal %165 : vector<8x1xf32> -> vector<8x1xf32>
    %167 = vector.broadcast %166 : vector<8x1xf32> to vector<8x8xf32>
    %168 = arith.mulf %163, %167 : vector<8x8xf32>
    %cst_73 = arith.constant dense<0.000000e+00> : vector<8x8xf32>
    %169 = tpu.matmul %168, %155, %cst_73 {dimension_numbers = #tpu.dot_dimension_numbers<[1], [0], [0], [1], [0, 0, 1, 1], [], []>} : vector<8x8xf32>, vector<8x8xf32>, vector<8x8xf32> -> vector<8x8xf32>
    %170 = vector.extract_strided_slice %145 {offsets = [0, 8], sizes = [8, 8], strides = [1, 1]} : vector<8x32xf32> to vector<8x8xf32>
    %171 = vector.extract_strided_slice %151 {offsets = [0, 8], sizes = [8, 8], strides = [1, 1]} : vector<8x32xf32> to vector<8x8xf32>
    %172 = vector.extract_strided_slice %152 {offsets = [0, 8], sizes = [8, 8], strides = [1, 1]} : vector<8x32xf32> to vector<8x8xf32>
    %cst_74 = arith.constant dense<0.000000e+00> : vector<8x8xf32>
    %173 = tpu.matmul %170, %171, %cst_74 {dimension_numbers = #tpu.dot_dimension_numbers<[1], [1], [0], [0], [0, 0, 1, 0], [], []>} : vector<8x8xf32>, vector<8x8xf32>, vector<8x8xf32> -> vector<8x8xf32>
    %cst_75 = arith.constant 0.353553385 : f32
    %174 = vector.broadcast %cst_75 : f32 to vector<8x8xf32>
    %175 = arith.mulf %173, %174 : vector<8x8xf32>
    %cst_76 = arith.constant dense<0xFF800000> : vector<8xf32>
    %176 = vector.multi_reduction <maximumf>, %175, %cst_76 [1] : vector<8x8xf32> to vector<8xf32>
    %177 = vector.shape_cast %176 : vector<8xf32> to vector<8x1xf32>
    %178 = vector.broadcast %177 : vector<8x1xf32> to vector<8x8xf32>
    %179 = arith.subf %175, %178 : vector<8x8xf32>
    %180 = math.exp %179 : vector<8x8xf32>
    %cst_77 = arith.constant dense<0.000000e+00> : vector<8xf32>
    %181 = vector.multi_reduction <add>, %180, %cst_77 [1] : vector<8x8xf32> to vector<8xf32>
    %182 = vector.shape_cast %181 : vector<8xf32> to vector<8x1xf32>
    %183 = tpu.reciprocal %182 : vector<8x1xf32> -> vector<8x1xf32>
    %184 = vector.broadcast %183 : vector<8x1xf32> to vector<8x8xf32>
    %185 = arith.mulf %180, %184 : vector<8x8xf32>
    %cst_78 = arith.constant dense<0.000000e+00> : vector<8x8xf32>
    %186 = tpu.matmul %185, %172, %cst_78 {dimension_numbers = #tpu.dot_dimension_numbers<[1], [0], [0], [1], [0, 0, 1, 1], [], []>} : vector<8x8xf32>, vector<8x8xf32>, vector<8x8xf32> -> vector<8x8xf32>
    %187 = vector.extract_strided_slice %145 {offsets = [0, 16], sizes = [8, 8], strides = [1, 1]} : vector<8x32xf32> to vector<8x8xf32>
    %188 = vector.extract_strided_slice %151 {offsets = [0, 16], sizes = [8, 8], strides = [1, 1]} : vector<8x32xf32> to vector<8x8xf32>
    %189 = vector.extract_strided_slice %152 {offsets = [0, 16], sizes = [8, 8], strides = [1, 1]} : vector<8x32xf32> to vector<8x8xf32>
    %cst_79 = arith.constant dense<0.000000e+00> : vector<8x8xf32>
    %190 = tpu.matmul %187, %188, %cst_79 {dimension_numbers = #tpu.dot_dimension_numbers<[1], [1], [0], [0], [0, 0, 1, 0], [], []>} : vector<8x8xf32>, vector<8x8xf32>, vector<8x8xf32> -> vector<8x8xf32>
    %cst_80 = arith.constant 0.353553385 : f32
    %191 = vector.broadcast %cst_80 : f32 to vector<8x8xf32>
    %192 = arith.mulf %190, %191 : vector<8x8xf32>
    %cst_81 = arith.constant dense<0xFF800000> : vector<8xf32>
    %193 = vector.multi_reduction <maximumf>, %192, %cst_81 [1] : vector<8x8xf32> to vector<8xf32>
    %194 = vector.shape_cast %193 : vector<8xf32> to vector<8x1xf32>
    %195 = vector.broadcast %194 : vector<8x1xf32> to vector<8x8xf32>
    %196 = arith.subf %192, %195 : vector<8x8xf32>
    %197 = math.exp %196 : vector<8x8xf32>
    %cst_82 = arith.constant dense<0.000000e+00> : vector<8xf32>
    %198 = vector.multi_reduction <add>, %197, %cst_82 [1] : vector<8x8xf32> to vector<8xf32>
    %199 = vector.shape_cast %198 : vector<8xf32> to vector<8x1xf32>
    %200 = tpu.reciprocal %199 : vector<8x1xf32> -> vector<8x1xf32>
    %201 = vector.broadcast %200 : vector<8x1xf32> to vector<8x8xf32>
    %202 = arith.mulf %197, %201 : vector<8x8xf32>
    %cst_83 = arith.constant dense<0.000000e+00> : vector<8x8xf32>
    %203 = tpu.matmul %202, %189, %cst_83 {dimension_numbers = #tpu.dot_dimension_numbers<[1], [0], [0], [1], [0, 0, 1, 1], [], []>} : vector<8x8xf32>, vector<8x8xf32>, vector<8x8xf32> -> vector<8x8xf32>
    %204 = vector.extract_strided_slice %145 {offsets = [0, 24], sizes = [8, 8], strides = [1, 1]} : vector<8x32xf32> to vector<8x8xf32>
    %205 = vector.extract_strided_slice %151 {offsets = [0, 24], sizes = [8, 8], strides = [1, 1]} : vector<8x32xf32> to vector<8x8xf32>
    %206 = vector.extract_strided_slice %152 {offsets = [0, 24], sizes = [8, 8], strides = [1, 1]} : vector<8x32xf32> to vector<8x8xf32>
    %cst_84 = arith.constant dense<0.000000e+00> : vector<8x8xf32>
    %207 = tpu.matmul %204, %205, %cst_84 {dimension_numbers = #tpu.dot_dimension_numbers<[1], [1], [0], [0], [0, 0, 1, 0], [], []>} : vector<8x8xf32>, vector<8x8xf32>, vector<8x8xf32> -> vector<8x8xf32>
    %cst_85 = arith.constant 0.353553385 : f32
    %208 = vector.broadcast %cst_85 : f32 to vector<8x8xf32>
    %209 = arith.mulf %207, %208 : vector<8x8xf32>
    %cst_86 = arith.constant dense<0xFF800000> : vector<8xf32>
    %210 = vector.multi_reduction <maximumf>, %209, %cst_86 [1] : vector<8x8xf32> to vector<8xf32>
    %211 = vector.shape_cast %210 : vector<8xf32> to vector<8x1xf32>
    %212 = vector.broadcast %211 : vector<8x1xf32> to vector<8x8xf32>
    %213 = arith.subf %209, %212 : vector<8x8xf32>
    %214 = math.exp %213 : vector<8x8xf32>
    %cst_87 = arith.constant dense<0.000000e+00> : vector<8xf32>
    %215 = vector.multi_reduction <add>, %214, %cst_87 [1] : vector<8x8xf32> to vector<8xf32>
    %216 = vector.shape_cast %215 : vector<8xf32> to vector<8x1xf32>
    %217 = tpu.reciprocal %216 : vector<8x1xf32> -> vector<8x1xf32>
    %218 = vector.broadcast %217 : vector<8x1xf32> to vector<8x8xf32>
    %219 = arith.mulf %214, %218 : vector<8x8xf32>
    %cst_88 = arith.constant dense<0.000000e+00> : vector<8x8xf32>
    %220 = tpu.matmul %219, %206, %cst_88 {dimension_numbers = #tpu.dot_dimension_numbers<[1], [0], [0], [1], [0, 0, 1, 1], [], []>} : vector<8x8xf32>, vector<8x8xf32>, vector<8x8xf32> -> vector<8x8xf32>
    %221 = tpu.concatenate %169, %186, %203, %220 in 1 : vector<8x8xf32>, vector<8x8xf32>, vector<8x8xf32>, vector<8x8xf32> -> vector<8x32xf32>
    %cst_89 = arith.constant dense<0.000000e+00> : vector<8x32xf32>
    %222 = tpu.matmul %221, %138, %cst_89 {dimension_numbers = #tpu.dot_dimension_numbers<[1], [0], [0], [1], [0, 0, 1, 1], [], []>} : vector<8x32xf32>, vector<32x32xf32>, vector<8x32xf32> -> vector<8x32xf32>
    %223 = vector.broadcast %140 : vector<1x32xf32> to vector<8x32xf32>
    %224 = arith.addf %222, %223 : vector<8x32xf32>
    %225 = arith.addf %132, %224 : vector<8x32xf32>
    %c0_90 = arith.constant 0 : index
    %c1 = arith.constant 1 : index
    %c0_91 = arith.constant 0 : index
    %226 = vector.load %arg13[%c0_90, %c1, %c0_91] : memref<1x3x32xf32, #tpu.memory_space<vmem>>, vector<1x1x32xf32>
    %227 = vector.shape_cast %226 : vector<1x1x32xf32> to vector<1x32xf32>
    %c0_92 = arith.constant 0 : index
    %c1_93 = arith.constant 1 : index
    %c0_94 = arith.constant 0 : index
    %228 = vector.load %arg14[%c0_92, %c1_93, %c0_94] : memref<1x3x32xf32, #tpu.memory_space<vmem>>, vector<1x1x32xf32>
    %229 = vector.shape_cast %228 : vector<1x1x32xf32> to vector<1x32xf32>
    %cst_95 = arith.constant dense<0.000000e+00> : vector<8xf32>
    %230 = vector.multi_reduction <add>, %225, %cst_95 [1] : vector<8x32xf32> to vector<8xf32>
    %231 = vector.shape_cast %230 : vector<8xf32> to vector<8x1xf32>
    %cst_96 = arith.constant 3.200000e+01 : f32
    %232 = vector.broadcast %cst_96 : f32 to vector<8x1xf32>
    %233 = arith.divf %231, %232 : vector<8x1xf32>
    %234 = vector.broadcast %233 : vector<8x1xf32> to vector<8x32xf32>
    %235 = arith.subf %225, %234 : vector<8x32xf32>
    %236 = arith.mulf %235, %235 : vector<8x32xf32>
    %cst_97 = arith.constant dense<0.000000e+00> : vector<8xf32>
    %237 = vector.multi_reduction <add>, %236, %cst_97 [1] : vector<8x32xf32> to vector<8xf32>
    %238 = vector.shape_cast %237 : vector<8xf32> to vector<8x1xf32>
    %cst_98 = arith.constant 3.200000e+01 : f32
    %239 = vector.broadcast %cst_98 : f32 to vector<8x1xf32>
    %240 = arith.divf %238, %239 : vector<8x1xf32>
    %241 = vector.broadcast %233 : vector<8x1xf32> to vector<8x32xf32>
    %242 = arith.subf %225, %241 : vector<8x32xf32>
    %cst_99 = arith.constant 9.99999974E-6 : f32
    %243 = vector.broadcast %cst_99 : f32 to vector<8x1xf32>
    %244 = arith.addf %240, %243 : vector<8x1xf32>
    %245 = math.rsqrt %244 : vector<8x1xf32>
    %246 = vector.broadcast %245 : vector<8x1xf32> to vector<8x32xf32>
    %247 = arith.mulf %242, %246 : vector<8x32xf32>
    %248 = vector.broadcast %227 : vector<1x32xf32> to vector<8x32xf32>
    %249 = arith.mulf %247, %248 : vector<8x32xf32>
    %250 = vector.broadcast %229 : vector<1x32xf32> to vector<8x32xf32>
    %251 = arith.addf %249, %250 : vector<8x32xf32>
    %c0_100 = arith.constant 0 : index
    %c0_101 = arith.constant 0 : index
    %c0_102 = arith.constant 0 : index
    %252 = vector.load %arg15[%c0_100, %c0_101, %c0_102] : memref<1x32x64xf32, #tpu.memory_space<vmem>>, vector<1x32x64xf32>
    %253 = vector.shape_cast %252 : vector<1x32x64xf32> to vector<32x64xf32>
    %cst_103 = arith.constant dense<0.000000e+00> : vector<8x64xf32>
    %254 = tpu.matmul %251, %253, %cst_103 {dimension_numbers = #tpu.dot_dimension_numbers<[1], [0], [0], [1], [0, 0, 1, 1], [], []>} : vector<8x32xf32>, vector<32x64xf32>, vector<8x64xf32> -> vector<8x64xf32>
    %c0_104 = arith.constant 0 : index
    %c0_105 = arith.constant 0 : index
    %c0_106 = arith.constant 0 : index
    %255 = vector.load %arg16[%c0_104, %c0_105, %c0_106] : memref<1x1x64xf32, #tpu.memory_space<vmem>>, vector<1x1x64xf32>
    %256 = vector.shape_cast %255 : vector<1x1x64xf32> to vector<1x64xf32>
    %257 = vector.broadcast %256 : vector<1x64xf32> to vector<8x64xf32>
    %258 = arith.addf %254, %257 : vector<8x64xf32>
    %cst_107 = arith.constant 0.000000e+00 : f32
    %259 = vector.broadcast %cst_107 : f32 to vector<8x64xf32>
    %260 = arith.maximumf %258, %259 : vector<8x64xf32>
    %c0_108 = arith.constant 0 : index
    %c0_109 = arith.constant 0 : index
    %c0_110 = arith.constant 0 : index
    %261 = vector.load %arg17[%c0_108, %c0_109, %c0_110] : memref<1x64x32xf32, #tpu.memory_space<vmem>>, vector<1x64x32xf32>
    %262 = vector.shape_cast %261 : vector<1x64x32xf32> to vector<64x32xf32>
    %cst_111 = arith.constant dense<0.000000e+00> : vector<8x32xf32>
    %263 = tpu.matmul %260, %262, %cst_111 {dimension_numbers = #tpu.dot_dimension_numbers<[1], [0], [0], [1], [0, 0, 1, 1], [], []>} : vector<8x64xf32>, vector<64x32xf32>, vector<8x32xf32> -> vector<8x32xf32>
    %c0_112 = arith.constant 0 : index
    %c0_113 = arith.constant 0 : index
    %c0_114 = arith.constant 0 : index
    %264 = vector.load %arg18[%c0_112, %c0_113, %c0_114] : memref<1x1x32xf32, #tpu.memory_space<vmem>>, vector<1x1x32xf32>
    %265 = vector.shape_cast %264 : vector<1x1x32xf32> to vector<1x32xf32>
    %266 = vector.broadcast %265 : vector<1x32xf32> to vector<8x32xf32>
    %267 = arith.addf %263, %266 : vector<8x32xf32>
    %268 = arith.addf %251, %267 : vector<8x32xf32>
    %c0_115 = arith.constant 0 : index
    %c2 = arith.constant 2 : index
    %c0_116 = arith.constant 0 : index
    %269 = vector.load %arg13[%c0_115, %c2, %c0_116] : memref<1x3x32xf32, #tpu.memory_space<vmem>>, vector<1x1x32xf32>
    %270 = vector.shape_cast %269 : vector<1x1x32xf32> to vector<1x32xf32>
    %c0_117 = arith.constant 0 : index
    %c2_118 = arith.constant 2 : index
    %c0_119 = arith.constant 0 : index
    %271 = vector.load %arg14[%c0_117, %c2_118, %c0_119] : memref<1x3x32xf32, #tpu.memory_space<vmem>>, vector<1x1x32xf32>
    %272 = vector.shape_cast %271 : vector<1x1x32xf32> to vector<1x32xf32>
    %cst_120 = arith.constant dense<0.000000e+00> : vector<8xf32>
    %273 = vector.multi_reduction <add>, %268, %cst_120 [1] : vector<8x32xf32> to vector<8xf32>
    %274 = vector.shape_cast %273 : vector<8xf32> to vector<8x1xf32>
    %cst_121 = arith.constant 3.200000e+01 : f32
    %275 = vector.broadcast %cst_121 : f32 to vector<8x1xf32>
    %276 = arith.divf %274, %275 : vector<8x1xf32>
    %277 = vector.broadcast %276 : vector<8x1xf32> to vector<8x32xf32>
    %278 = arith.subf %268, %277 : vector<8x32xf32>
    %279 = arith.mulf %278, %278 : vector<8x32xf32>
    %cst_122 = arith.constant dense<0.000000e+00> : vector<8xf32>
    %280 = vector.multi_reduction <add>, %279, %cst_122 [1] : vector<8x32xf32> to vector<8xf32>
    %281 = vector.shape_cast %280 : vector<8xf32> to vector<8x1xf32>
    %cst_123 = arith.constant 3.200000e+01 : f32
    %282 = vector.broadcast %cst_123 : f32 to vector<8x1xf32>
    %283 = arith.divf %281, %282 : vector<8x1xf32>
    %284 = vector.broadcast %276 : vector<8x1xf32> to vector<8x32xf32>
    %285 = arith.subf %268, %284 : vector<8x32xf32>
    %cst_124 = arith.constant 9.99999974E-6 : f32
    %286 = vector.broadcast %cst_124 : f32 to vector<8x1xf32>
    %287 = arith.addf %283, %286 : vector<8x1xf32>
    %288 = math.rsqrt %287 : vector<8x1xf32>
    %289 = vector.broadcast %288 : vector<8x1xf32> to vector<8x32xf32>
    %290 = arith.mulf %285, %289 : vector<8x32xf32>
    %291 = vector.broadcast %270 : vector<1x32xf32> to vector<8x32xf32>
    %292 = arith.mulf %290, %291 : vector<8x32xf32>
    %293 = vector.broadcast %272 : vector<1x32xf32> to vector<8x32xf32>
    %294 = arith.addf %292, %293 : vector<8x32xf32>
    %c0_125 = arith.constant 0 : index
    %c0_126 = arith.constant 0 : index
    %295 = vector.load %arg22[%c0_125, %c0_126] : memref<8x32xf32, #tpu.memory_space<vmem>>, vector<8x32xf32>
    tpu.vector_store %arg22[%c0_125, %c0_126], %294 {strides = array<i32>} : memref<8x32xf32, #tpu.memory_space<vmem>>, vector<8x32xf32>,
    %c1_i32 = arith.constant 1 : i32
    %296 = arith.cmpi eq, %arg1, %c1_i32 : i32
    %297 = arith.extui %296 : i1 to i32
    %c0_i32_127 = arith.constant 0 : i32
    %298 = arith.cmpi ne, %297, %c0_i32_127 : i32
    scf.if %298 {
      %c0_128 = arith.constant 0 : index
      %c0_129 = arith.constant 0 : index
      %299 = vector.load %arg19[%c0_128, %c0_129] : memref<32x128xf32, #tpu.memory_space<vmem>>, vector<32x128xf32>
      %cst_130 = arith.constant dense<0.000000e+00> : vector<8x128xf32>
      %300 = tpu.matmul %294, %299, %cst_130 {dimension_numbers = #tpu.dot_dimension_numbers<[1], [0], [0], [1], [0, 0, 1, 1], [], []>} : vector<8x32xf32>, vector<32x128xf32>, vector<8x128xf32> -> vector<8x128xf32>
      %c0_131 = arith.constant 0 : index
      %c0_132 = arith.constant 0 : index
      %301 = vector.load %arg20[%c0_131, %c0_132] : memref<1x128xf32, #tpu.memory_space<vmem>>, vector<1x128xf32>
      %302 = vector.broadcast %301 : vector<1x128xf32> to vector<8x128xf32>
      %303 = arith.addf %300, %302 : vector<8x128xf32>
      %c0_133 = arith.constant 0 : index
      %c0_134 = arith.constant 0 : index
      %c0_135 = arith.constant 0 : index
      %304 = vector.load %arg21[%c0_133, %c0_134, %c0_135] : memref<1x8x128xf32, #tpu.memory_space<vmem>>, vector<1x8x128xf32>
      %305 = vector.shape_cast %304 : vector<1x8x128xf32> to vector<8x128xf32>
      %306 = vector.shape_cast %303 : vector<8x128xf32> to vector<1x8x128xf32>
      tpu.vector_store %arg21[%c0_133, %c0_134, %c0_135], %306 {strides = array<i32>} : memref<1x8x128xf32, #tpu.memory_space<vmem>>, vector<1x8x128xf32>,
    } else {
    }
    return
  }
  func.func @transform_0(%arg0: i32, %arg1: i32) -> (i32, i32, i32) {
    %c0_i32 = arith.constant 0 : i32
    %c0_i32_0 = arith.constant 0 : i32
    %c0_i32_1 = arith.constant 0 : i32
    return %arg0, %c0_i32, %c0_i32_0 : i32, i32, i32
  }
  func.func @transform_1(%arg0: i32, %arg1: i32) -> (i32, i32, i32, i32) {
    %c0_i32 = arith.constant 0 : i32
    %c0_i32_0 = arith.constant 0 : i32
    %c0_i32_1 = arith.constant 0 : i32
    return %arg1, %arg0, %c0_i32, %c0_i32_0 : i32, i32, i32, i32
  }
  func.func @transform_2(%arg0: i32, %arg1: i32) -> (i32, i32, i32) {
    %c0_i32 = arith.constant 0 : i32
    %c0_i32_0 = arith.constant 0 : i32
    %c0_i32_1 = arith.constant 0 : i32
    return %arg0, %c0_i32, %c0_i32_0 : i32, i32, i32
  }
  func.func @transform_3(%arg0: i32, %arg1: i32) -> (i32, i32, i32) {
    %c0_i32 = arith.constant 0 : i32
    %c0_i32_0 = arith.constant 0 : i32
    %c0_i32_1 = arith.constant 0 : i32
    return %arg1, %c0_i32, %c0_i32_0 : i32, i32, i32
  }
  func.func @transform_4(%arg0: i32, %arg1: i32) -> (i32, i32, i32) {
    %c0_i32 = arith.constant 0 : i32
    %c0_i32_0 = arith.constant 0 : i32
    %c0_i32_1 = arith.constant 0 : i32
    return %arg1, %c0_i32, %c0_i32_0 : i32, i32, i32
  }
  func.func @transform_5(%arg0: i32, %arg1: i32) -> (i32, i32, i32) {
    %c0_i32 = arith.constant 0 : i32
    %c0_i32_0 = arith.constant 0 : i32
    %c0_i32_1 = arith.constant 0 : i32
    return %arg1, %c0_i32, %c0_i32_0 : i32, i32, i32
  }
  func.func @transform_6(%arg0: i32, %arg1: i32) -> (i32, i32, i32) {
    %c0_i32 = arith.constant 0 : i32
    %c0_i32_0 = arith.constant 0 : i32
    %c0_i32_1 = arith.constant 0 : i32
    return %arg1, %c0_i32, %c0_i32_0 : i32, i32, i32
  }
  func.func @transform_7(%arg0: i32, %arg1: i32) -> (i32, i32, i32) {
    %c0_i32 = arith.constant 0 : i32
    %c0_i32_0 = arith.constant 0 : i32
    %c0_i32_1 = arith.constant 0 : i32
    return %arg1, %c0_i32, %c0_i32_0 : i32, i32, i32
  }
  func.func @transform_8(%arg0: i32, %arg1: i32) -> (i32, i32, i32) {
    %c0_i32 = arith.constant 0 : i32
    %c0_i32_0 = arith.constant 0 : i32
    %c0_i32_1 = arith.constant 0 : i32
    return %arg1, %c0_i32, %c0_i32_0 : i32, i32, i32
  }
  func.func @transform_9(%arg0: i32, %arg1: i32) -> (i32, i32, i32) {
    %c0_i32 = arith.constant 0 : i32
    %c0_i32_0 = arith.constant 0 : i32
    %c0_i32_1 = arith.constant 0 : i32
    return %arg1, %c0_i32, %c0_i32_0 : i32, i32, i32
  }
  func.func @transform_10(%arg0: i32, %arg1: i32) -> (i32, i32, i32) {
    %c0_i32 = arith.constant 0 : i32
    %c0_i32_0 = arith.constant 0 : i32
    %c0_i32_1 = arith.constant 0 : i32
    return %arg1, %c0_i32, %c0_i32_0 : i32, i32, i32
  }
  func.func @transform_11(%arg0: i32, %arg1: i32) -> (i32, i32, i32) {
    %c0_i32 = arith.constant 0 : i32
    %c0_i32_0 = arith.constant 0 : i32
    %c0_i32_1 = arith.constant 0 : i32
    return %arg1, %c0_i32, %c0_i32_0 : i32, i32, i32
  }
  func.func @transform_12(%arg0: i32, %arg1: i32) -> (i32, i32, i32) {
    %c0_i32 = arith.constant 0 : i32
    %c0_i32_0 = arith.constant 0 : i32
    %c0_i32_1 = arith.constant 0 : i32
    return %arg1, %c0_i32, %c0_i32_0 : i32, i32, i32
  }
  func.func @transform_13(%arg0: i32, %arg1: i32) -> (i32, i32, i32) {
    %c0_i32 = arith.constant 0 : i32
    %c0_i32_0 = arith.constant 0 : i32
    %c0_i32_1 = arith.constant 0 : i32
    return %arg1, %c0_i32, %c0_i32_0 : i32, i32, i32
  }
  func.func @transform_14(%arg0: i32, %arg1: i32) -> (i32, i32, i32) {
    %c0_i32 = arith.constant 0 : i32
    %c0_i32_0 = arith.constant 0 : i32
    %c0_i32_1 = arith.constant 0 : i32
    return %arg1, %c0_i32, %c0_i32_0 : i32, i32, i32
  }
  func.func @transform_15(%arg0: i32, %arg1: i32) -> (i32, i32, i32) {
    %c0_i32 = arith.constant 0 : i32
    %c0_i32_0 = arith.constant 0 : i32
    %c0_i32_1 = arith.constant 0 : i32
    return %arg1, %c0_i32, %c0_i32_0 : i32, i32, i32
  }
  func.func @transform_16(%arg0: i32, %arg1: i32) -> (i32, i32, i32) {
    %c0_i32 = arith.constant 0 : i32
    %c0_i32_0 = arith.constant 0 : i32
    %c0_i32_1 = arith.constant 0 : i32
    return %arg1, %c0_i32, %c0_i32_0 : i32, i32, i32
  }
  func.func @transform_17(%arg0: i32, %arg1: i32) -> (i32, i32) {
    %c0_i32 = arith.constant 0 : i32
    %c0_i32_0 = arith.constant 0 : i32
    %c0_i32_1 = arith.constant 0 : i32
    return %c0_i32, %c0_i32_0 : i32, i32
  }
  func.func @transform_18(%arg0: i32, %arg1: i32) -> (i32, i32) {
    %c0_i32 = arith.constant 0 : i32
    %c0_i32_0 = arith.constant 0 : i32
    %c0_i32_1 = arith.constant 0 : i32
    return %c0_i32, %c0_i32_0 : i32, i32
  }
  func.func @transform_19(%arg0: i32, %arg1: i32) -> (i32, i32, i32) {
    %c0_i32 = arith.constant 0 : i32
    %c0_i32_0 = arith.constant 0 : i32
    %c0_i32_1 = arith.constant 0 : i32
    return %arg0, %c0_i32, %c0_i32_0 : i32, i32, i32
  }
}

</mosaic_0001>

<bundles_post_ra>
// kernel: ufnet_forward.2
= control target key start
LH: loop header
LB: loop body
LE: loop exit
PB: predicated region body
PF: predicated region fallthrough
CT: control target
= control target key end

     0   :  { %s1260_s30 = smov 0   ;;  %s1262_s10 = smov 0   ;;  %s1419_s0 = inlined_call_operand.vmem [shape: f32[2,8,32], index: 0, kind: input, shape index: {}]   ;;  %s1420_s1 = inlined_call_operand.vmem [shape: f32[32,64], index: 1, kind: input, shape index: {}]   ;;  %s1421_s2 = inlined_call_operand.vmem [shape: f32[8,16], index: 2, kind: input, shape index: {}]   ;;  %s1422_s3 = inlined_call_operand.vmem [shape: f32[2,2,32], index: 3, kind: input, shape index: {}]   ;;  %s1423_s4 = inlined_call_operand.vmem [shape: f32[2,2,32], index: 4, kind: input, shape index: {}]   ;;  %s1424_s5 = inlined_call_operand.vmem [shape: f32[2,32,64], index: 5, kind: input, shape index: {}]   ;;  %s1425_s6 = inlined_call_operand.vmem [shape: f32[2,1,64], index: 6, kind: input, shape index: {}]   ;;  %s1426_s7 = inlined_call_operand.vmem [shape: f32[2,64,32], index: 7, kind: input, shape index: {}]   ;;  %s1427_s8 = inlined_call_operand.vmem [shape: f32[2,1,32], index: 8, kind: input, shape index: {}]   ;;  %s1428_s9 = inlined_call_operand.vmem [shape: f32[2,2,8,32], index: 9, kind: output, shape index: {}]  }
   0x1   :  { %1431 = sst [smem:[#allocation7_spill]] %s1419_s0  ;;  %s1264_s11 = smov 0  }
   0x2   :  { %1432 = sst [smem:[#allocation8_spill]] %s1422_s3  ;;  %s1266_s12 = smov 0  }
   0x3   :  { %1433 = sst [smem:[#allocation9_spill]] %s1423_s4  ;;  %s1268_s13 = smov 0  }
   0x4 LB: > { %1434 = sst [smem:[#allocation3_spill]] %s1196_s11  ;;  %s28_s14 = sadd.s32 1, %s1196_s11  ;;  %s1204_s13 = sphi %s1268_s13, %s19_s13   ;;  %s1200_s12 = sphi %s1266_s12, %s1444_s12   ;;  %s1196_s11 = sphi %s1264_s11, %s1443_s11   ;;  %s1192_s10 = sphi %s1262_s10, %s1442_s10   ;;  %s1188_s30 = sphi %s1260_s30, %s1441_s30  }
   0x5   : > { %1435 = sst [smem:[#allocation4_spill]] %s1200_s12  ;;  %s31_s15 = sadd.s32 1, %s1200_s12 }
   0x6   : > { %p29_p0 = scmp.ge.s32.totalorder %s28_s14, 2  ;;  %p996_p1 = scmp.ge.s32.totalorder %s1204_s13, 1 }
   0x7   : > { %p354_p2 = scmp.lt.s32.totalorder %s1204_s13, 5 }
   0x8   : > { %s1446_s14 = smov (%p29_p0, %s28_s14), 0  ;;  %s1448_s15 = smov (!%p29_p0, %s31_s15), %s1200_s12 }
   0x9   : > { %1436 = sst [smem:[#allocation5_spill]] %s1446_s14  ;;  %p355_p3 = pnand %p996_p1, %p354_p2 }
   0xa   : > { %p33_p4 = scmp.ge.s32.totalorder %s1448_s15, 2  ;;  %p416_p5 = scmp.lt.s32.totalorder (!%p355_p3), %s1192_s10, 1 }
   0xb   : > { %358 = sbr.rel (%p355_p3) target bundleno = 1648 (0x670), region = 56  ;;  %p420_p6 = scmp.lt.s32.totalorder (!%p355_p3), %s1188_s30, 1 }
   0xc   : > { %s1450_s15 = smov (%p33_p4, %s1448_s15), 0  ;;  %s1438_s0 = sld [smem:[#allocation7_spill]] (!%p355_p3) }
   0xd   : > { %1437 = sst [smem:[#allocation6_spill]] %s1450_s15  ;;  %s1439_s3 = sld [smem:[#allocation8_spill]] (!%p355_p3) }
   0xe   : > { %s1440_s4 = sld [smem:[#allocation9_spill]] (!%p355_p3)  ;;  %p1006_p7 = scmp.ne.s32.totalorder (!%p355_p3), %s1188_s30, 0 }
  0x12   : > { %s1452_s10 = smov (!%p416_p5, %s1192_s10), 1  ;;  %vm457_vm0 = vcmask (!%p1006_p7), 261120  }
  0x13   : > { %s1294_s16 = scalar_select %p420_p6, %s1188_s30, 1 }
  0x14   : > { %s997_s17 = sshll.u32 %s1452_s10, 3 }
  0x15   : > { %s419_s20 = scalar_lea.vmem %s1438_s0, %s997_s17  ;;  %s998_s21 = sshll.u32 %s1294_s16, 1 }
  0x16   : > { %s1303_s24 = scalar_lea.vmem %s1439_s3, %s998_s21  ;;  %s1308_s27 = scalar_lea.vmem %s1440_s4, %s998_s21  ;;  %v456_v0 = vld [vmem:[%s419_s20] sm:$0xff] (!%p1006_p7) }
  0x17   : > { %s1019_s28 = sshll.u32 %s1294_s16, 5  ;;  %s435_s14 = scalar_lea.vmem %s1425_s6, %s1294_s16  ;;  %458 = vst.msk [vmem:[#allocation2] sm:$0xff] (!%p1006_p7), %vm457_vm0, %v456_v0 }
  0x18   : > { %s1318_s17 = scalar_lea.vmem %s1424_s5, %s1019_s28  ;;  %s1020_s18 = sshll.u32 %s1294_s16, 6 }
  0x19   : > { %s1324_s23 = scalar_lea.vmem %s1426_s7, %s1020_s18  ;;  %s443_s26 = scalar_lea.vmem %s1427_s8, %s1294_s16 }
  0x1a   : > { %s449_s3 = sadd.s32 %s998_s21, %s1452_s10  ;;  %455 = sbr.rel (%p1006_p7) target bundleno = 33 (0x21), region = 60 }
  0x1b   : > { %s1330_s4 = sshll.u32 %s449_s3, 3 }
  0x1c   : > { %s451_s11 = scalar_lea.vmem %s1428_s9, %s1330_s4 }
  0x21 PF: > { %v460_v1 = vld [vmem:[%s1420_s1] sm:$0xff]  ;;  %v461_v2 = vld [vmem:[%s1420_s1 + $0x8] sm:$0xff]  ;;  %v462_v3 = vld [vmem:[%s1420_s1 + $0x10] sm:$0xff]  ;;  %v1206_v4 = vmov 0.0|0.0   ;;  %vm1207_vm1 = vmmov 0   ;;  %v1208_v7 = vmov 0.0  }
  0x22   : > { %1091 = vmatprep.subr.bf16.mxu1 %v1206_v4  ;;  %v1092_v5 = vpack.c.bf16 %v461_v2, %v460_v1  ;;  %v463_v6 = vld [vmem:[%s1420_s1 + $0x18] sm:$0xff]  ;;  %1051 = vmatprep.mubr.msk.f32.mxu1 %vm1207_vm1, %v1208_v7  ;;  %v459_v9 = vld [vmem:[#allocation2] sm:$0xff]  ;;  %vm464_vm2 = vcmask 261120   ;;  %s1209_s18 = smov 96   ;;  %vm543_vm3 = vcmask 130048   ;;  %v645_v25 = vld [vmem:[%s1318_s17 + $0x8] sm:$0xff] }
  0x23   : > { %1106 = vmatprep.subr.bf16.mxu0 %v1206_v4  ;;  %1088 = vmatprep.mubr.msk.f32.mxu0 %vm1207_vm1, %v1208_v7  ;;  %v1095_v8 = vpack.c.bf16 %v463_v6, %v462_v3  ;;  %v542_v14 = vld [vmem:[%s1421_s2] sm:$0xff]  ;;  %v646_v27 = vld [vmem:[%s1318_s17 + $0x10] sm:$0xff]  ;;  %v647_v28 = vld [vmem:[%s1318_s17 + $0x18] sm:$0xff]  ;;  %vm744_vm4 = vcmask 523264  }
  0x24   : > { %1093 = vmatpush3.bf16.msra.mxu1 %v1092_v5  ;;  %v644_v24 = vld [vmem:[%s1318_s17] sm:$0xff]  ;;  %v1104_v29 = vpack.c.bf16 %v647_v28, %v646_v27  ;;  %v730_v31 = vld [vmem:[%s1324_s23 + $0x8] sm:$0xff]  ;;  %v731_v32 = vld [vmem:[%s1324_s23 + $0x10] sm:$0xff] }
  0x25   : > { %1094 = vmatprep.subr.bf16.mxu1 %v1206_v4  ;;  %v1101_v26 = vpack.c.bf16 %v645_v25, %v644_v24  ;;  %v729_v30 = vld [vmem:[%s1324_s23] sm:$0xff]  ;;  %v732_v34 = vld [vmem:[%s1324_s23 + $0x18] sm:$0xff]  ;;  %v734_v37 = vld [vmem:[%s1324_s23 + $0x28] sm:$0xff] }
  0x26   : > { %v1107_v33 = vpack.c.bf16 %v730_v31, %v729_v30  ;;  %v1110_v35 = vpack.c.bf16 %v732_v34, %v731_v32  ;;  %v733_v36 = vld [vmem:[%s1324_s23 + $0x20] sm:$0xff]  ;;  %v735_v48 = vld [vmem:[%s1324_s23 + $0x30] sm:$0xff]  ;;  %v736_v49 = vld [vmem:[%s1324_s23 + $0x38] sm:$0xff] }
  0x27   : > { %v1113_v38 = vpack.c.bf16 %v734_v37, %v733_v36  ;;  %v1009_v43 = vld [vmem:[%s1303_s24] ss:$0 sm:$0xff]  ;;  %v1116_v50 = vpack.c.bf16 %v736_v49, %v735_v48 }
  0x28   : > { %1096 = vmatpush3.bf16.msra.mxu1 %v1095_v8  ;;  %1108 = vmatpush3.bf16.msra.mxu0 %v1107_v33  ;;  %v1010_v45 = vld [vmem:[%s1308_s27] ss:$0 sm:$0xff] }
  0x29   : > { %1097 = vmatprep.subr.bf16.mxu1 %v1206_v4  ;;  %1109 = vmatprep.subr.bf16.mxu0 %v1206_v4  ;;  %v1011_v51 = vld [vmem:[%s435_s14] ss:$0 sm:$0xff] }
  0x2a   : > { %v1013_v56 = vld [vmem:[%s443_s26] ss:$0 sm:$0xff] }
  0x2b   : > { %1052 = vmatmul.mubr.msk.f32.vlgmr.msra.gmra.mrb[0].mxu1 %vm464_vm2, %v459_v9 }
  0x2c   : > { %1058 = vmatprep.mubr.msk.f32.mxu1 %vm1207_vm1, %v1208_v7  ;;  %1111 = vmatpush3.bf16.msra.mxu0 %v1110_v35 }
  0x2d   : > { %1112 = vmatprep.subr.bf16.mxu0 %v1206_v4 }
  0x30   : > { %1114 = vmatpush3.bf16.msra.mxu0 %v1113_v38 }
  0x31   : > { %1115 = vmatprep.subr.bf16.mxu0 %v1206_v4 }
  0x34   : > { %1117 = vmatpush3.bf16.msra.mxu0 %v1116_v50 }
  0xfe   : > { %v534_v10 = vpop.f32.mrb[0].mxu1 }
  0xff   : > { %539 = vrot.lane.b32.xlu0 %v534_v10, %s1209_s18  ;;  %v1053_v11 = vpop.f32.mrb[1].mxu1 }
 0x171   : > { %v540_v12 = vpop.permute.xlu0 %539 }
 0x172   : > { %v1098_v13 = vpack.c.bf16 %v540_v12, %v534_v10 }
 0x174   : > { %1099 = vmatpush3.bf16.msra.mxu1 %v1098_v13 }
 0x175   : > { %1100 = vmatprep.subr.bf16.mxu1 %v1206_v4 }
 0x177   : > { %1059 = vmatmul.mubr.msk.f32.vlgmr.msra.gmra.mrb[2].mxu1 %vm543_vm3, %v542_v14 }
 0x178   : > { %1069 = vmatprep.mubr.msk.f32.mxu1 %vm1207_vm1, %v1208_v7  ;;  %1102 = vmatpush3.bf16.msra.mxu1 %v1101_v26  ;;  %v1015_v7 = vld [vmem:[%s1303_s24 + $0x1] ss:$0 sm:$0xff] }
 0x179   : > { %1103 = vmatprep.subr.bf16.mxu1 %v1206_v4 }
 0x17c   : > { %1105 = vmatpush3.bf16.msra.mxu1 %v1104_v29 }
 0x24a   : > { %v613_v15 = vpop.f32.mrb[2].mxu1 }
 0x24b   : > { %v617_v16 = vadd.f32 %v613_v15, %v459_v9  ;;  %v1060_v17 = vpop.f32.mrb[3].mxu1  ;;  %v1016_v9 = vld [vmem:[%s1308_s27 + $0x1] ss:$0 sm:$0xff] }
 0x24d   : > { %v620_v18 = vsel %vm464_vm2, %v617_v16, 0.0 }
 0x24e   : > { %621 = vadd.xlane.f32.xlu0 %v620_v18 }
 0x2db   : > { %v622_v19 = vpop.xlane.xlu0 %621 }
 0x2dc   : > { %v624_v20 = vmul.f32 0.03125, %v622_v19 }
 0x2de   : > { %v625_v21 = vsub.f32 %v617_v16, %v624_v20 }
 0x2e0   : > { %v626_v22 = vmul.f32 %v625_v21, %v625_v21 }
 0x2e2   : > { %v627_v23 = vsel %vm464_vm2, %v626_v22, 0.0 }
 0x2e3   : > { %628 = vadd.xlane.f32.xlu1 %v627_v23 }
 0x370   : > { %v629_v39 = vpop.xlane.xlu1 %628 }
 0x371   : > { %v630_v40 = vmul.f32 0.03125, %v629_v39 }
 0x373   : > { %v631_v41 = vadd.f32 1e-05, %v630_v40 }
 0x375   : > { %1162 = vrsqrt.f32 %v631_v41 }
 0x37f   : > { %v1163_v42 = vpop.eup %1162 }
 0x380   : > { %v633_v44 = vmul.f32 %v1163_v42, %v625_v21 }
 0x382   : > { %v638_v46 = vmul.f32 %v1009_v43, %v633_v44 }
 0x384   : > { %v643_v47 = vadd.f32 %v1010_v45, %v638_v46 }
 0x386   : > { %1070 = vmatmul.mubr.msk.f32.vlgmr.msra.gmra.mrb[4].mxu1 %vm464_vm2, %v643_v47 }
 0x459   : > { %v724_v52 = vpop.f32.mrb[4].mxu1 }
 0x45a   : > { %v725_v53 = vadd.f32 %v1011_v51, %v724_v52  ;;  %v1071_v54 = vpop.f32.mrb[5].mxu1 }
 0x45c   : > { %v728_v55 = vmax.f32 %v725_v53, 0.0 }
 0x45e   : > { %1089 = vmatmul.mubr.msk.f32.vlgmr.msra.gmra.mrb[0].mxu0 %vm744_vm4, %v728_v55 }
 0x531   : > { %v814_v57 = vpop.f32.mrb[0].mxu0 }
 0x532   : > { %v815_v58 = vadd.f32 %v1013_v56, %v814_v57  ;;  %v1090_v59 = vpop.f32.mrb[1].mxu0 }
 0x534   : > { %v818_v60 = vadd.f32 %v815_v58, %v643_v47 }
 0x536   : > { %v821_v61 = vsel %vm464_vm2, %v818_v60, 0.0 }
 0x537   : > { %822 = vadd.xlane.f32.xlu1 %v821_v61 }
 0x5c4   : > { %v823_v62 = vpop.xlane.xlu1 %822 }
 0x5c5   : > { %v824_v63 = vmul.f32 0.03125, %v823_v62 }
 0x5c7   : > { %v825_v0 = vsub.f32 %v818_v60, %v824_v63 }
 0x5c9   : > { %v826_v1 = vmul.f32 %v825_v0, %v825_v0 }
 0x5cb   : > { %v827_v2 = vsel %vm464_vm2, %v826_v1, 0.0 }
 0x5cc   : > { %828 = vadd.xlane.f32.xlu1 %v827_v2 }
 0x659   : > { %v829_v3 = vpop.xlane.xlu1 %828 }
 0x65a   : > { %v830_v4 = vmul.f32 0.03125, %v829_v3 }
 0x65c   : > { %v831_v5 = vadd.f32 1e-05, %v830_v4 }
 0x65e   : > { %1164 = vrsqrt.f32 %v831_v5 }
 0x668   : > { %v1165_v6 = vpop.eup %1164 }
 0x669   : > { %v833_v8 = vmul.f32 %v1165_v6, %v825_v0 }
 0x66b   : > { %v838_v10 = vmul.f32 %v1015_v7, %v833_v8 }
 0x66d   : > { %v843_v11 = vadd.f32 %v1016_v9, %v838_v10 }
 0x66f   : > { %844 = vst.msk [vmem:[#allocation2] sm:$0xff] %vm464_vm2, %v843_v11  ;;  %845 = vst.msk [vmem:[%s451_s11] sm:$0xff] %vm464_vm2, %v843_v11 }
 0x670 PF: > { %s19_s13 = sadd.s32 1, %s1204_s13   ;;  %s1441_s30 = sld [smem:[#allocation3_spill]] }
 0x671   : > { %p16_p8 = scmp.ge.s32.totalorder %s19_s13, 6   ;;  %s1442_s10 = sld [smem:[#allocation4_spill]] }
 0x672   : > { %s1443_s11 = sld [smem:[#allocation5_spill]]  ;;  %s1444_s12 = sld [smem:[#allocation6_spill]] }
 0x673   :  { %18 = sbr.rel (!%p16_p8) target bundleno = 4 (0x4), region = 108 }

// kernel: ufnet_forward.3
= control target key start
LH: loop header
LB: loop body
LE: loop exit
PB: predicated region body
PF: predicated region fallthrough
CT: control target
= control target key end

     0   :  { %s4554_s0 = inlined_call_operand.vmem [shape: f32[2,8,32], index: 0, kind: input, shape index: {}]   ;;  %s4555_s1 = inlined_call_operand.vmem [shape: f32[2,2,8,32], index: 1, kind: input, shape index: {}]   ;;  %s4556_s2 = inlined_call_operand.vmem [shape: f32[2,1,8], index: 2, kind: input, shape index: {}]   ;;  %s4557_s3 = inlined_call_operand.vmem [shape: f32[2,32,96], index: 3, kind: input, shape index: {}]   ;;  %s4558_s4 = inlined_call_operand.vmem [shape: f32[2,1,96], index: 4, kind: input, shape index: {}]   ;;  %s4559_s5 = inlined_call_operand.vmem [shape: f32[2,32,32], index: 5, kind: input, shape index: {}]   ;;  %s4560_s6 = inlined_call_operand.vmem [shape: f32[2,1,32], index: 6, kind: input, shape index: {}]   ;;  %s4561_s7 = inlined_call_operand.vmem [shape: f32[2,32,96], index: 7, kind: input, shape index: {}]   ;;  %s4562_s8 = inlined_call_operand.vmem [shape: f32[2,1,96], index: 8, kind: input, shape index: {}]   ;;  %s4563_s9 = inlined_call_operand.vmem [shape: f32[2,32,32], index: 9, kind: input, shape index: {}]   ;;  %s4564_s10 = inlined_call_operand.vmem [shape: f32[2,1,32], index: 10, kind: input, shape index: {}]   ;;  %s4565_s11 = inlined_call_operand.vmem [shape: f32[2,3,32], index: 11, kind: input, shape index: {}]   ;;  %s4566_s12 = inlined_call_operand.vmem [shape: f32[2,3,32], index: 12, kind: input, shape index: {}]   ;;  %s4567_s13 = inlined_call_operand.vmem [shape: f32[2,32,64], index: 13, kind: input, shape index: {}]   ;;  %s4568_s14 = inlined_call_operand.vmem [shape: f32[2,1,64], index: 14, kind: input, shape index: {}]   ;;  %s4569_s15 = inlined_call_operand.vmem [shape: f32[2,64,32], index: 15, kind: input, shape index: {}]   ;;  %s4570_s16 = inlined_call_operand.vmem [shape: f32[2,1,32], index: 16, kind: input, shape index: {}]   ;;  %s4571_s17 = inlined_call_operand.vmem [shape: f32[32,128], index: 17, kind: input, shape index: {}]   ;;  %s4572_s18 = inlined_call_operand.vmem [shape: f32[1,128], index: 18, kind: input, shape index: {}]   ;;  %s4573_s19 = inlined_call_operand.hbm [shape: f32[2,8,128], index: 19, kind: output, shape index: {}]  }
   0x1   :  { %4592 = sst [smem:[#allocation21_spill]] %s4554_s0 }
   0x2   :  { %4593 = sst [smem:[#allocation22_spill]] %s4555_s1 }
   0x3   :  { %4594 = sst [smem:[#allocation23_spill]] %s4556_s2 }
   0x4   :  { %4595 = sst [smem:[#allocation24_spill]] %s4557_s3 }
   0x5   :  { %4596 = sst [smem:[#allocation25_spill]] %s4559_s5 }
   0x6   :  { %4597 = sst [smem:[#allocation26_spill]] %s4561_s7 }
   0x7   :  { %4598 = sst [smem:[#allocation27_spill]] %s4562_s8 }
   0x8   :  { %4599 = sst [smem:[#allocation28_spill]] %s4563_s9 }
   0x9   :  { %4600 = sst [smem:[#allocation29_spill]] %s4564_s10 }
   0xa   :  { %4601 = sst [smem:[#allocation30_spill]] %s4565_s11 }
   0xb   :  { %4602 = sst [smem:[#allocation31_spill]] %s4566_s12 }
   0xc   :  { %4603 = sst [smem:[#allocation32_spill]] %s4567_s13 }
   0xd   :  { %4604 = sst [smem:[#allocation33_spill]] %s4568_s14 }
   0xe   :  { %4605 = sst [smem:[#allocation34_spill]] %s4569_s15 }
   0xf   :  { %4606 = sst [smem:[#allocation35_spill]] %s4570_s16 }
  0x10   :  { %4607 = sst [smem:[#allocation36_spill]] %s4571_s17 }
  0x11   :  { %4608 = sst [smem:[#allocation37_spill]] %s4572_s18 }
  0x12   :  { %4609 = sst [smem:[#allocation38_spill]] %s4573_s19 }
  0x13   :  { %24 = vsyncpa [#allocation4], 0 }
  0x14   :  { %26 = vsyncpa [#allocation4 + $0x1], 0  ;;  %s4054_s0 = smov 0   ;;  %s4056_s30 = smov 0  }
  0x15   :  { %s4058_s20 = smov 0   ;;  %s4060_s21 = smov 0  }
  0x16   :  { %s4062_s1 = smov 0   ;;  %s4064_s22 = smov 0  }
  0x17   :  { %s4066_s2 = smov 0   ;;  %s4068_s23 = smov 0  }
  0x18 LB: > { %4610 = sst [smem:[#allocation6_spill]] %s3903_s0  ;;  %s3311_s24 = sadd.s32 4294967295, %s3931_s23   ;;  %s3931_s23 = sphi %s4068_s23, %s32_s23   ;;  %s3927_s2 = sphi %s4066_s2, %s4672_s2   ;;  %s3923_s22 = sphi %s4064_s22, %s4671_s22   ;;  %s3919_s1 = sphi %s4062_s1, %s4670_s1   ;;  %s3915_s21 = sphi %s4060_s21, %s4669_s21   ;;  %s3911_s20 = sphi %s4058_s20, %s4668_s20   ;;  %s3907_s30 = sphi %s4056_s30, %s4667_s30   ;;  %s3903_s0 = sphi %s4054_s0, %s4666_s0  }
  0x19   : > { %4611 = sst [smem:[#allocation7_spill]] %s3907_s30  ;;  %s3312_s25 = sadd.s32 4294967294, %s3931_s23  }
  0x1a   : > { %4612 = sst [smem:[#allocation8_spill]] %s3911_s20  ;;  %s41_s3 = sadd.s32 1, %s3923_s22 }
  0x1b   : > { %4613 = sst [smem:[#allocation9_spill]] %s3915_s21  ;;  %p42_p0 = scmp.ge.s32.totalorder %s41_s3, 2 }
  0x1c   : > { %4614 = sst [smem:[#allocation10_spill]] %s3919_s1  ;;  %s44_s26 = sadd.s32 1, %s3927_s2 }
  0x1d   : > { %4615 = sst [smem:[#allocation11_spill]] %s3923_s22  ;;  %p547_p1 = scmp.ne.s32.totalorder %s3911_s20, %s3907_s30 }
  0x1e   : > { %4616 = sst [smem:[#allocation12_spill]] %s3927_s2  ;;  %p548_p2 = scmp.eq.s32.totalorder %s3311_s24, 3 }
  0x1f   : > { %4617 = sst [smem:[#allocation13_spill]] %s3931_s23  ;;  %s4674_s3 = smov (%p42_p0, %s41_s3), 0 }
  0x20   : > { %4618 = sst [smem:[#allocation14_spill]] %s4674_s3  ;;  %s4676_s26 = smov (!%p42_p0, %s44_s26), %s3927_s2 }
  0x21   : > { %p4103_p3 = por %p548_p2, %p547_p1  ;;  %p553_p4 = scmp.ne.s32.totalorder %s3907_s30, %s3903_s0 }
  0x22   : > { %p46_p5 = scmp.ge.s32.totalorder %s4676_s26, 2  ;;  %p554_p6 = scmp.eq.s32.totalorder %s3312_s25, 3 }
  0x23   : > { %s4619_s27 = scalar_select %p4103_p3, 1, 0 }
  0x24   : > { %p3315_p7 = scmp.ge.s32.totalorder %s3931_s23, 1  ;;  %p700_p8 = scmp.lt.s32.totalorder %s3931_s23, 5 }
  0x25   : > { %4620 = sst [smem:[#allocation15_spill]] %s4619_s27  ;;  %s4678_s26 = smov (%p46_p5, %s4676_s26), 0 }
  0x26   : > { %4621 = sst [smem:[#allocation16_spill]] %s4678_s26  ;;  %p4113_p9 = por %p554_p6, %p553_p4 }
  0x27   : > { %p701_p10 = pnand %p3315_p7, %p700_p8  ;;  %s534_s29 = ssub.s32 %s3927_s2, %s4678_s26 }
  0x28   : > { %s4622_s28 = scalar_select %p4113_p9, 1, 0 }
  0x29   : > { %s537_s24 = sadd.s32 1, %s3911_s20  ;;  %p535_p11 = scmp.eq.s32.totalorder %s534_s29, 0 }
  0x2a   : > { %4623 = sst [smem:[#allocation17_spill]] %s4622_s28  ;;  %704 = sbr.rel (%p701_p10) target bundleno = 4577 (0x11e1), region = 96 }
  0x2b   : > { %s4121_s3 = scalar_select %p535_p11, %s3911_s20, %s537_s24  }
  0x2d   : > { %4624 = sst [smem:[#allocation18_spill]] %s4121_s3 }
  0x31   : > { %s4578_s25 = sand.u32 1, %s3907_s30   ;;  %p822_p12 = scmp.lt.s32.totalorder %s3919_s1, 1 }
  0x32   : > { %s4127_s22 = sshll.u32 %s4578_s25, 3  ;;  %p826_p13 = scmp.lt.s32.totalorder %s3915_s21, 1 }
  0x33   : > { %s4131_s28 = scalar_select %p822_p12, %s3919_s1, 1 }
  0x34   : > { %s4134_s29 = scalar_select %p826_p13, %s3915_s21, 1 }
  0x35   : > { %s3317_s24 = sshll.u32 %s4131_s28, 3  ;;  %s4626_s23 = sld [smem:[#allocation21_spill]] }
  0x36   : > { %s3318_s27 = sshll.u32 %s4134_s29, 1  ;;  %s3386_s1 = sshll.u32 %s4134_s29, 5 }
  0x37   : > { %s831_s30 = sadd.s32 %s3318_s27, %s4131_s28  ;;  %s4627_s16 = sld [smem:[#allocation24_spill]] }
  0x38   : > { %s3319_s18 = sshll.u32 %s831_s30, 3  ;;  %s4628_s11 = sld [smem:[#allocation22_spill]] }
  0x39   : > { %s4629_s5 = sld [smem:[#allocation25_spill]]  ;;  %s4630_s7 = sld [smem:[#allocation26_spill]] }
  0x3a   : > { %s4632_s9 = sld [smem:[#allocation28_spill]]  ;;  %s3328_s30 = sshll.u32 %s4134_s29, 2 }
  0x3b   : > { %s825_s19 = scalar_lea.vmem %s4626_s23, %s3317_s24  ;;  %s4635_s13 = sld [smem:[#allocation32_spill]] }
  0x3c   : > { %s4638_s3 = sld [smem:[#allocation31_spill]]  ;;  %s4639_s20 = sld [smem:[#allocation33_spill]] }
  0x3d   : > { %s841_s15 = scalar_lea.vmem %s4627_s16, %s3386_s1  ;;  %s3391_s0 = sshll.u32 %s4134_s29, 6 }
  0x3e   : > { %s4153_s2 = scalar_lea.vmem %s4628_s11, %s3319_s18  ;;  %s4640_s16 = sld [smem:[#allocation34_spill]] }
  0x3f   : > { %s4162_s27 = scalar_lea.vmem %s4629_s5, %s3386_s1  ;;  %s4171_s12 = scalar_lea.vmem %s4630_s7, %s3386_s1 }
  0x40   : > { %s4180_s25 = scalar_lea.vmem %s4632_s9, %s3386_s1  ;;  %s4637_s7 = sld [smem:[#allocation30_spill]] }
  0x41   : > { %4633 = sst [smem:[#allocation19_spill]] %s4180_s25  ;;  %s4190_s17 = scalar_lea.vmem %s4635_s13, %s3386_s1 }
  0x42   : > { %4636 = sst [smem:[#allocation20_spill]] %s4190_s17  ;;  %s4200_s26 = scalar_lea.vmem %s4638_s3, %s3328_s30 }
  0x43   : > { %s884_s23 = scalar_lea.vmem %s4639_s20, %s4134_s29  ;;  %s4641_s5 = sld [smem:[#allocation35_spill]] }
  0x44   : > { %s4210_s1 = scalar_lea.vmem %s4640_s16, %s3391_s0  ;;  %s821_s21 = scalar_lea.vmem [#allocation3], %s4127_s22 }
  0x45   : > { %s4642_s17 = sld [smem:[#allocation9_spill]] }
  0x46   : > { %s4195_s11 = scalar_lea.vmem %s4637_s7, %s3328_s30 }
  0x49   : > { %s892_s7 = scalar_lea.vmem %s4641_s5, %s4134_s29 }
  0x4b   : > { %p3334_p0 = scmp.ne.s32.totalorder %s4642_s17, 0 }
  0x4c   : > { %v897_v0 = vld [vmem:[%s825_s19] sm:$0xff] (!%p3334_p0)  ;;  %vm898_vm0 = vcmask (!%p3334_p0), 261120  }
  0x4d   : > { %896 = sbr.rel (%p3334_p0) target bundleno = 84 (0x54), region = 100  ;;  %899 = vst.msk [vmem:[#allocation2] sm:$0xff] (!%p3334_p0), %vm898_vm0, %v897_v0 }
  0x54 PF: > { %v916_v1 = vld [vmem:[%s841_s15] sm:$0xff]  ;;  %v917_v2 = vld [vmem:[%s841_s15 + $0x8] sm:$0xff]  ;;  %v918_v3 = vld [vmem:[%s841_s15 + $0x10] sm:$0xff]  ;;  %v3933_v4 = vmov 0.0|0.0   ;;  %vm3934_vm1 = vmmov 0   ;;  %v3935_v7 = vmov 0.0   ;;  %s4643_s10 = scalar_lea.vmem %s4558_s4, %s4134_s29  ;;  %v902_v21 = vlaneseq  ;;  %s4646_s14 = scalar_lea.vmem %s4560_s6, %s4134_s29 }
  0x55   : > { %3644 = vmatprep.subr.bf16.mxu1 %v3933_v4  ;;  %v3645_v5 = vpack.c.bf16 %v917_v2, %v916_v1  ;;  %v919_v6 = vld [vmem:[%s841_s15 + $0x18] sm:$0xff]  ;;  %3476 = vmatprep.mubr.msk.f32.mxu1 %vm3934_vm1, %v3935_v7  ;;  %v4225_v9 = vld [vmem:[#allocation2] sm:$0xff]  ;;  %vm932_vm2 = vcmask 261120   ;;  %s3936_s13 = smov 120   ;;  %s3937_s15 = smov 96   ;;  %vm1009_vm3 = vcmask 64512  }
  0x56   : > { %3489 = vmatprep.subr.mxu0 %v3935_v7  ;;  %3491 = vmatprep.mubr.msk.f32.mxu0 %vm3934_vm1, %v3935_v7  ;;  %v3648_v8 = vpack.c.bf16 %v919_v6, %v918_v3  ;;  %v3336_v10 = vld [vmem:[%s4643_s10] ss:$0 sm:$0xff]  ;;  %s3938_s19 = smov 80   ;;  %s3939_s25 = smov 88   ;;  %v903_v22 = vshrl.u32 %v902_v21, 7  ;;  %v905_v23 = vand.u32 127, %v902_v21 }
  0x57   : > { %3646 = vmatpush3.bf16.msra.mxu1 %v3645_v5  ;;  %s3940_s0 = smov 72   ;;  %s3941_s18 = smov 112   ;;  %vm1687_vm5 = vcmask 130048   ;;  %vm1689_vm6 = vcmask 195584   ;;  %vm2860_vm7 = vcmask 523264  }
  0x58   : > { %3647 = vmatprep.subr.bf16.mxu1 %v3933_v4  ;;  %s3942_s30 = smov 104   ;;  %vm906_vm4 = vcmp.gt.s32.totalorder %v905_v23, %v903_v22  ;;  %s4644_s3 = sld [smem:[#allocation23_spill]]  ;;  %v921_v22 = vld [vmem:[%s4162_s27] sm:$0xff]  ;;  %v922_v23 = vld [vmem:[%s4162_s27 + $0x8] sm:$0xff] }
  0x59   : > { %v907_v24 = vsel %vm906_vm4, -1e+09, %v3935_v7  ;;  %s3944_s16 = smov 64   ;;  %s3945_s24 = smov 48  }
  0x5a   : > { %s3946_s5 = smov 40   ;;  %s3947_s8 = smov 8  }
  0x5b   : > { %3649 = vmatpush3.bf16.msra.mxu1 %v3648_v8  ;;  %s3948_s9 = smov 16   ;;  %s3949_s10 = smov 24  }
  0x5c   : > { %3479 = vmatprep.subr.mxu1 %v3935_v7 }
  0x5e   : > { %3477 = vmatmul.mubr.msk.f32.vlgmr.msra.gmra.mrb[0].mxu1 %vm932_vm2, %v4225_v9  ;;  %s4645_s20 = scalar_lea.vmem %s4644_s3, %s4131_s28  ;;  %s3943_s28 = smov 56  }
  0x5f   : > { %3481 = vmatprep.mubr.msk.f32.mxu1 %vm3934_vm1, %v3935_v7  ;;  %v3335_v25 = vld [vmem:[%s4645_s20] ss:$0 sm:$0xff]  ;;  %s4647_s20 = sld [smem:[#allocation27_spill]] }
  0x60   : > { %v915_v26 = vadd.f32 %v3335_v25, %v907_v24  ;;  %v3651_v24 = vpack.c.bf16 %v922_v23, %v921_v22 }
 0x131   : > { %v1002_v11 = vpop.f32.mrb[0].mxu1 }
 0x132   : > { %v4237_v12 = vadd.f32 %v3336_v10, %v1002_v11  ;;  %v3478_v13 = vpop.f32.mrb[1].mxu1 }
 0x134   : > { %1173 = vrot.lane.b32.xlu1 %v4237_v12, %s3936_s13  ;;  %1007 = vrot.lane.b32.xlu0 %v4237_v12, %s3937_s15 }
 0x138   : > { %1342 = vrot.lane.b32.xlu1 %v4237_v12, %s3938_s19  ;;  %1175 = vrot.lane.b32.xlu0 %v4237_v12, %s3939_s25 }
 0x13c   : > { %1509 = vrot.lane.b32.xlu1 %v4237_v12, %s3940_s0  ;;  %1340 = vrot.lane.b32.xlu0 %v4237_v12, %s3941_s18 }
 0x140   : > { %1507 = vrot.lane.b32.xlu0 %v4237_v12, %s3942_s30 }
 0x1a6   : > { %v1174_v14 = vpop.permute.xlu1 %1173  ;;  %v1008_v15 = vpop.permute.xlu0 %1007 }
 0x1a7   : > { %3480 = vmatpush3.xpose.msk.msra.mxu1 %vm1009_vm3, %v1008_v15 }
 0x1a8   : > { %3484 = vmatprep.subr.mxu1 %v3935_v7 }
 0x1aa   : > { %3482 = vmatmul.mubr.msk.f32.vlgmr.msra.gmra.mrb[2].mxu1 %vm1009_vm3, %v4237_v12  ;;  %v1176_v16 = vpop.permute.xlu0 %1175  ;;  %v1343_v17 = vpop.permute.xlu1 %1342 }
 0x1ab   : > { %3490 = vmatpush3.xpose.msk.msra.mxu0 %vm1009_vm3, %v1176_v16  ;;  %3486 = vmatprep.mubr.msk.f32.mxu1 %vm3934_vm1, %v3935_v7 }
 0x1ac   : > { %3499 = vmatprep.subr.mxu0 %v3935_v7 }
 0x1ae   : > { %3492 = vmatmul.mubr.msk.f32.vlgmr.msra.gmra.mrb[0].mxu0 %vm1009_vm3, %v1174_v14  ;;  %v1341_v18 = vpop.permute.xlu0 %1340  ;;  %v1510_v19 = vpop.permute.xlu1 %1509 }
 0x1af   : > { %3500 = vmatpush3.xpose.msk.msra.mxu0 %vm1009_vm3, %v1343_v17  ;;  %3501 = vmatprep.mubr.msk.f32.mxu0 %vm3934_vm1, %v3935_v7 }
 0x1b0   : > { %3509 = vmatprep.subr.mxu0 %v3935_v7 }
 0x1b2   : > { %3502 = vmatmul.mubr.msk.f32.vlgmr.msra.gmra.mrb[2].mxu0 %vm1009_vm3, %v1341_v18  ;;  %v1508_v20 = vpop.permute.xlu0 %1507 }
 0x1b3   : > { %3510 = vmatpush3.xpose.msk.msra.mxu0 %vm1009_vm3, %v1510_v19  ;;  %3511 = vmatprep.mubr.msk.f32.mxu0 %vm3934_vm1, %v3935_v7 }
 0x1b4   : > { %3650 = vmatprep.subr.bf16.mxu0 %v3933_v4 }
 0x1b6   : > { %3512 = vmatmul.mubr.msk.f32.vlgmr.msra.gmra.mrb[4].mxu0 %vm1009_vm3, %v1508_v20 }
 0x1b7   : > { %3527 = vmatprep.mubr.msk.f32.mxu0 %vm3934_vm1, %v3935_v7  ;;  %3652 = vmatpush3.bf16.msra.mxu0 %v3651_v24 }
 0x1b8   : > { %3653 = vmatprep.subr.bf16.mxu0 %v3933_v4 }
 0x27d   : > { %v1080_v27 = vpop.f32.mrb[2].mxu1 }
 0x27e   : > { %v1084_v28 = vmul.f32 0.35355338, %v1080_v27  ;;  %v3483_v29 = vpop.f32.mrb[3].mxu1 }
 0x27f   : > { %v923_v29 = vld [vmem:[%s4162_s27 + $0x10] sm:$0xff] }
 0x280   : > { %v1085_v30 = vadd.f32 %v1084_v28, %v915_v26 }
 0x281   : > { %v1247_v31 = vpop.f32.mrb[0].mxu0 }
 0x282   : > { %v1251_v32 = vmul.f32 0.35355338, %v1247_v31  ;;  %v3493_v33 = vpop.f32.mrb[1].mxu0  ;;  %v1086_v34 = vsel %vm1009_vm3, %v1085_v30, -inf }
 0x283   : > { %1087 = vmax.xlane.f32.xlu1 %v1086_v34 }
 0x284   : > { %v1252_v35 = vadd.f32 %v1251_v32, %v915_v26 }
 0x285   : > { %v1414_v36 = vpop.f32.mrb[2].mxu0 }
 0x286   : > { %v1418_v37 = vmul.f32 0.35355338, %v1414_v36  ;;  %v3503_v38 = vpop.f32.mrb[3].mxu0  ;;  %v1253_v39 = vsel %vm1009_vm3, %v1252_v35, -inf }
 0x287   : > { %1254 = vmax.xlane.f32.xlu0 %v1253_v39 }
 0x288   : > { %v1419_v40 = vadd.f32 %v1418_v37, %v915_v26 }
 0x289   : > { %v1581_v41 = vpop.f32.mrb[4].mxu0 }
 0x28a   : > { %v1585_v42 = vmul.f32 0.35355338, %v1581_v41  ;;  %v3513_v43 = vpop.f32.mrb[5].mxu0  ;;  %v1420_v44 = vsel %vm1009_vm3, %v1419_v40, -inf }
 0x28b   : > { %1421 = vmax.xlane.f32.xlu0 %v1420_v44 }
 0x28c   : > { %v1586_v45 = vadd.f32 %v1585_v42, %v915_v26  ;;  %v3350_v42 = vld [vmem:[%s4646_s14] ss:$0 sm:$0xff] }
 0x28e   : > { %v1587_v46 = vsel %vm1009_vm3, %v1586_v45, -inf }
 0x28f   : > { %1588 = vmax.xlane.f32.xlu1 %v1587_v46 }
 0x2a0   : > { %1264 = vrot.lane.b32.xlu1 %v4237_v12, %s3943_s28  ;;  %s4648_s28 = scalar_lea.vmem %s4647_s20, %s4134_s29 }
 0x310   : > { %v1088_v47 = vpop.xlane.xlu1 %1087 }
 0x311   : > { %v1089_v48 = vsub.f32 %v1085_v30, %v1088_v47  ;;  %v924_v30 = vld [vmem:[%s4162_s27 + $0x18] sm:$0xff] }
 0x312   : > { %v3654_v31 = vpack.c.bf16 %v924_v30, %v923_v29 }
 0x313   : > { %v1090_v49 = vmul.f32 1.442695, %v1089_v48  ;;  %v1797_v48 = vld [vmem:[%s4171_s12] sm:$0xff] }
 0x314   : > { %v1255_v50 = vpop.xlane.xlu0 %1254  ;;  %3655 = vmatpush3.bf16.msra.mxu0 %v3654_v31 }
 0x315   : > { %3799 = vpow2.f32 %v1090_v49  ;;  %v1256_v51 = vsub.f32 %v1252_v35, %v1255_v50  ;;  %3662 = vmatprep.subr.bf16.mxu0 %v3933_v4  ;;  %v1798_v49 = vld [vmem:[%s4171_s12 + $0x8] sm:$0xff]  ;;  %v1799_v50 = vld [vmem:[%s4171_s12 + $0x10] sm:$0xff] }
 0x317   : > { %v1257_v52 = vmul.f32 1.442695, %v1256_v51  ;;  %v3789_v51 = vpack.i.bf16 %v1798_v49, %v1797_v48 }
 0x318   : > { %v1422_v62 = vpop.xlane.xlu0 %1421 }
 0x319   : > { %3801 = vpow2.f32 %v1257_v52  ;;  %v1423_v63 = vsub.f32 %v1419_v40, %v1422_v62  ;;  %v3657_v52 = vpack.c.bf16 %v1798_v49, %v1797_v48 }
 0x31b   : > { %v1424_v0 = vmul.f32 1.442695, %v1423_v63 }
 0x31c   : > { %v1589_v53 = vpop.xlane.xlu1 %1588 }
 0x31d   : > { %v1590_v54 = vsub.f32 %v1586_v45, %v1589_v53  ;;  %v1800_v53 = vld [vmem:[%s4171_s12 + $0x18] sm:$0xff] }
 0x31f   : > { %v3800_v55 = vpop.eup %3799  ;;  %v1591_v56 = vmul.f32 1.442695, %v1590_v54  ;;  %v3794_v54 = vpack.i.bf16 %v1800_v53, %v1799_v50 }
 0x320   : > { %v1092_v57 = vsel %vm1009_vm3, %v3800_v55, 0.0  ;;  %v1265_v3 = vpop.permute.xlu1 %1264 }
 0x321   : > { %3803 = vpow2.f32 %v1591_v56  ;;  %1093 = vadd.xlane.f32.xlu0 %v1092_v57 }
 0x322   : > { %3805 = vpow2.f32 %v1424_v0  ;;  %v3354_v0 = vld [vmem:[%s4648_s28] ss:$0 sm:$0xff] }
 0x323   : > { %v3802_v58 = vpop.eup %3801 }
 0x324   : > { %v1259_v59 = vsel %vm1009_vm3, %v3802_v58, 0.0 }
 0x325   : > { %1260 = vadd.xlane.f32.xlu1 %v1259_v59 }
 0x32b   : > { %v3804_v60 = vpop.eup %3803 }
 0x32c   : > { %v1593_v61 = vsel %vm1009_vm3, %v3804_v60, 0.0  ;;  %v3806_v1 = vpop.eup %3805 }
 0x32d   : > { %1594 = vadd.xlane.f32.xlu1 %v1593_v61  ;;  %v1426_v2 = vsel %vm1009_vm3, %v3806_v1, 0.0 }
 0x337   : > { %1097 = vrot.lane.b32.xlu0 %v4237_v12, %s3944_s16 }
 0x33e   : > { %1431 = vrot.lane.b32.xlu1 %v4237_v12, %s3945_s24 }
 0x356   : > { %1427 = vadd.xlane.f32.xlu0 %v1426_v2 }
 0x36c   : > { %1598 = vrot.lane.b32.xlu0 %v4237_v12, %s3946_s5 }
 0x3ae   : > { %v1094_v5 = vpop.xlane.xlu0 %1093 }
 0x3af   : > { %3807 = vrcp.f32 %v1094_v5 }
 0x3b2   : > { %v1098_v6 = vpop.permute.xlu0 %1097  ;;  %v1261_v8 = vpop.xlane.xlu1 %1260 }
 0x3b3   : > { %3809 = vrcp.f32 %v1261_v8  ;;  %3485 = vmatpush3.msra.mxu1 %v1098_v6 }
 0x3b4   : > { %3494 = vmatprep.subr.mxu1 %v3935_v7 }
 0x3b9   : > { %v3808_v10 = vpop.eup %3807 }
 0x3ba   : > { %v1096_v11 = vmul.f32 %v3808_v10, %v3800_v55  ;;  %v1595_v13 = vpop.xlane.xlu1 %1594  ;;  %v3660_v55 = vpack.c.bf16 %v1800_v53, %v1799_v50 }
 0x3bc   : > { %3487 = vmatmul.mubr.msk.f32.vlgmr.msra.gmra.mrb[4].mxu1 %vm1009_vm3, %v1096_v11  ;;  %v901_v11 = vld [vmem:[%s4153_s2] sm:$0xff]  ;;  %s4649_s2 = sld [smem:[#allocation19_spill]] }
 0x3bd   : > { %v3810_v14 = vpop.eup %3809  ;;  %3495 = vmatpush3.msra.mxu1 %v1265_v3  ;;  %3496 = vmatprep.mubr.msk.f32.mxu1 %vm3934_vm1, %v3935_v7 }
 0x3be   : > { %v1263_v12 = vmul.f32 %v3810_v14, %v3802_v58  ;;  %v1432_v15 = vpop.permute.xlu1 %1431  ;;  %3504 = vmatprep.subr.mxu1 %v3935_v7  ;;  %v3352_v14 = vld [vmem:[%s4195_s11] ss:$0 sm:$0xff] }
 0x3c0   : > { %3497 = vmatmul.mubr.msk.f32.vlgmr.msra.gmra.mrb[6].mxu1 %vm1009_vm3, %v1263_v12 }
 0x3c1   : > { %3505 = vmatpush3.msra.mxu1 %v1432_v15  ;;  %3506 = vmatprep.mubr.msk.f32.mxu1 %vm3934_vm1, %v3935_v7  ;;  %v3353_v15 = vld [vmem:[%s4200_s26] ss:$0 sm:$0xff] }
 0x3c2   : > { %3514 = vmatprep.subr.mxu1 %v3935_v7 }
 0x3e3   : > { %v1428_v16 = vpop.xlane.xlu0 %1427 }
 0x3e4   : > { %3811 = vrcp.f32 %v1428_v16 }
 0x3e5   : > { %3813 = vrcp.f32 %v1595_v13 }
 0x3e7   : > { %v1599_v20 = vpop.permute.xlu0 %1598 }
 0x3ee   : > { %v3812_v17 = vpop.eup %3811 }
 0x3ef   : > { %v1430_v18 = vmul.f32 %v3812_v17, %v3806_v1  ;;  %v3814_v19 = vpop.eup %3813 }
 0x3f0   : > { %v1597_v21 = vmul.f32 %v3814_v19, %v3804_v60 }
 0x3f1   : > { %3507 = vmatmul.mubr.msk.f32.vlgmr.msra.gmra.mrb[8].mxu1 %vm1009_vm3, %v1430_v18 }
 0x3f2   : > { %3515 = vmatpush3.msra.mxu1 %v1599_v20  ;;  %3516 = vmatprep.mubr.msk.f32.mxu1 %vm3934_vm1, %v3935_v7 }
 0x3f3   : > { %3656 = vmatprep.subr.bf16.mxu1 %v3933_v4 }
 0x3f5   : > { %3517 = vmatmul.mubr.msk.f32.vlgmr.msra.gmra.mrb[10].mxu1 %vm1009_vm3, %v1597_v21 }
 0x3f6   : > { %3538 = vmatprep.mubr.msk.f32.mxu1 %vm3934_vm1, %v3935_v7  ;;  %3658 = vmatpush3.bf16.msra.mxu1 %v3657_v52 }
 0x3f7   : > { %3659 = vmatprep.subr.bf16.mxu1 %v3933_v4 }
 0x3fa   : > { %3661 = vmatpush3.bf16.msra.mxu1 %v3660_v55 }
 0x3fb   : > { %3552 = vmatprep.subr.mxu1 %v3935_v7 }
 0x48f   : > { %v1169_v25 = vpop.f32.mrb[4].mxu1 }
 0x490   : > { %v3488_v26 = vpop.f32.mrb[5].mxu1 }
 0x493   : > { %v1336_v27 = vpop.f32.mrb[6].mxu1 }
 0x494   : > { %1675 = vrot.lane.b32.xlu1 %v1336_v27, %s3947_s8  ;;  %v3498_v28 = vpop.f32.mrb[7].mxu1 }
 0x4c4   : > { %v1503_v32 = vpop.f32.mrb[8].mxu1 }
 0x4c5   : > { %1679 = vrot.lane.b32.xlu0 %v1503_v32, %s3948_s9  ;;  %v3508_v33 = vpop.f32.mrb[9].mxu1 }
 0x4c8   : > { %v1670_v34 = vpop.f32.mrb[10].mxu1 }
 0x4c9   : > { %1683 = vrot.lane.b32.xlu1 %v1670_v34, %s3949_s10  ;;  %v3518_v35 = vpop.f32.mrb[11].mxu1 }
 0x506   : > { %v1676_v36 = vpop.permute.xlu1 %1675 }
 0x507   : > { %v1686_v38 = vsel %vm1009_vm3, %v1169_v25, %v1676_v36 }
 0x537   : > { %v1680_v37 = vpop.permute.xlu0 %1679 }
 0x538   : > { %v1688_v39 = vsel %vm1687_vm5, %v1686_v38, %v1680_v37 }
 0x53b   : > { %v1684_v40 = vpop.permute.xlu1 %1683 }
 0x53c   : > { %v1690_v41 = vsel %vm1689_vm6, %v1688_v39, %v1684_v40 }
 0x53d   : > { %3528 = vmatmul.mubr.msk.f32.vlgmr.msra.gmra.mrb[6].mxu0 %vm932_vm2, %v1690_v41 }
 0x53e   : > { %3549 = vmatprep.mubr.msk.f32.mxu0 %vm3934_vm1, %v3935_v7 }
 0x610   : > { %v1766_v43 = vpop.f32.mrb[6].mxu0 }
 0x611   : > { %v1767_v44 = vadd.f32 %v3350_v42, %v1766_v43  ;;  %v3529_v45 = vpop.f32.mrb[7].mxu0 }
 0x613   : > { %v1770_v46 = vadd.f32 %v1767_v44, %v4225_v9 }
 0x615   : > { %v1773_v47 = vsel %vm932_vm2, %v1770_v46, 0.0 }
 0x616   : > { %1774 = vadd.xlane.f32.xlu0 %v1773_v47 }
 0x62c   : > { %3790 = vrot.lane.b32.xlu0 %v3789_v51, %s3937_s15 }
 0x630   : > { %1902 = vrot.lane.b32.xlu0 %v3354_v0, %s3937_s15 }
 0x6a3   : > { %v1775_v9 = vpop.xlane.xlu0 %1774 }
 0x6a4   : > { %v1777_v56 = vmul.f32 0.03125, %v1775_v9 }
 0x6a6   : > { %v1778_v57 = vsub.f32 %v1770_v46, %v1777_v56 }
 0x6a7   : > { %v3791_v60 = vpop.permute.xlu0 %3790 }
 0x6a8   : > { %v1779_v58 = vmul.f32 %v1778_v57, %v1778_v57  ;;  %v3793_v61 = vunpack.i.h.bf16 %v3791_v60  ;;  %v3792_v62 = vunpack.i.l.bf16 %v3791_v60 }
 0x6aa   : > { %v1780_v59 = vsel %vm932_vm2, %v1779_v58, 0.0  ;;  %v3663_v63 = vpack.c.bf16 %v3793_v61, %v3792_v62 }
 0x6ab   : > { %1781 = vadd.xlane.f32.xlu1 %v1780_v59  ;;  %v1903_v18 = vpop.permute.xlu0 %1902 }
 0x6ac   : > { %3664 = vmatpush3.bf16.msra.mxu0 %v3663_v63 }
 0x6ad   : > { %3665 = vmatprep.subr.bf16.mxu0 %v3933_v4 }
 0x6bc   : > { %3795 = vrot.lane.b32.xlu1 %v3794_v54, %s3937_s15 }
 0x738   : > { %v1782_v1 = vpop.xlane.xlu1 %1781 }
 0x739   : > { %v1783_v2 = vmul.f32 0.03125, %v1782_v1 }
 0x73b   : > { %v1784_v3 = vadd.f32 1e-05, %v1783_v2 }
 0x73c   : > { %v3796_v5 = vpop.permute.xlu1 %3795 }
 0x73d   : > { %3815 = vrsqrt.f32 %v1784_v3  ;;  %v3798_v6 = vunpack.i.h.bf16 %v3796_v5  ;;  %v3797_v8 = vunpack.i.l.bf16 %v3796_v5 }
 0x73f   : > { %v3666_v10 = vpack.c.bf16 %v3798_v6, %v3797_v8 }
 0x741   : > { %3667 = vmatpush3.bf16.msra.mxu0 %v3666_v10 }
 0x742   : > { %3562 = vmatprep.subr.mxu0 %v3935_v7 }
 0x744   : > { %3550 = vmatmul.mubr.msk.f32.vlgmr.msra.gmra.mrb[8].mxu0 %vm932_vm2, %v901_v11 }
 0x745   : > { %3564 = vmatprep.mubr.msk.f32.mxu0 %vm3934_vm1, %v3935_v7 }
 0x747   : > { %v3816_v13 = vpop.eup %3815 }
 0x748   : > { %v1786_v12 = vmul.f32 %v3816_v13, %v1778_v57 }
 0x74a   : > { %v1791_v16 = vmul.f32 %v3352_v14, %v1786_v12 }
 0x74c   : > { %v4353_v17 = vadd.f32 %v3353_v15, %v1791_v16 }
 0x74e   : > { %3539 = vmatmul.mubr.msk.f32.vlgmr.msra.gmra.mrb[12].mxu1 %vm932_vm2, %v4353_v17 }
 0x74f   : > { %3554 = vmatprep.mubr.msk.f32.mxu1 %vm3934_vm1, %v3935_v7 }
 0x817   : > { %v1974_v19 = vpop.f32.mrb[8].mxu0 }
 0x818   : > { %v4359_v20 = vadd.f32 %v1974_v19, %v1903_v18  ;;  %v3551_v21 = vpop.f32.mrb[9].mxu0 }
 0x81a   : > { %2144 = vrot.lane.b32.xlu1 %v4359_v20, %s3936_s13  ;;  %3553 = vmatpush3.xpose.msk.msra.mxu1 %vm1009_vm3, %v4359_v20 }
 0x81b   : > { %3557 = vmatprep.subr.mxu1 %v3935_v7 }
 0x81e   : > { %2310 = vrot.lane.b32.xlu1 %v4359_v20, %s3941_s18 }
 0x821   : > { %v1882_v22 = vpop.f32.mrb[12].mxu1 }
 0x822   : > { %v1883_v23 = vadd.f32 %v3354_v0, %v1882_v22  ;;  %2476 = vrot.lane.b32.xlu1 %v4359_v20, %s3942_s30  ;;  %v3540_v24 = vpop.f32.mrb[13].mxu1 }
 0x823   : > { %v1802_v24 = vld [vmem:[%s4649_s2] sm:$0xff] }
 0x824   : > { %2142 = vrot.lane.b32.xlu0 %v1883_v23, %s3936_s13  ;;  %3555 = vmatmul.mubr.msk.f32.vlgmr.msra.gmra.mrb[14].mxu1 %vm1009_vm3, %v1883_v23  ;;  %s4650_s13 = sld [smem:[#allocation20_spill]] }
 0x825   : > { %3559 = vmatprep.mubr.msk.f32.mxu1 %vm3934_vm1, %v3935_v7 }
 0x828   : > { %2308 = vrot.lane.b32.xlu0 %v1883_v23, %s3941_s18 }
 0x82c   : > { %2474 = vrot.lane.b32.xlu0 %v1883_v23, %s3942_s30 }
 0x88c   : > { %v2145_v25 = vpop.permute.xlu1 %2144 }
 0x88d   : > { %3563 = vmatpush3.xpose.msk.msra.mxu0 %vm1009_vm3, %v2145_v25  ;;  %v1803_v25 = vld [vmem:[%s4649_s2 + $0x8] sm:$0xff] }
 0x88e   : > { %3572 = vmatprep.subr.mxu0 %v3935_v7 }
 0x890   : > { %v2311_v26 = vpop.permute.xlu1 %2310 }
 0x894   : > { %v2477_v29 = vpop.permute.xlu1 %2476 }
 0x896   : > { %v2143_v27 = vpop.permute.xlu0 %2142 }
 0x897   : > { %3565 = vmatmul.mubr.msk.f32.vlgmr.msra.gmra.mrb[10].mxu0 %vm1009_vm3, %v2143_v27  ;;  %v1804_v27 = vld [vmem:[%s4649_s2 + $0x10] sm:$0xff] }
 0x898   : > { %3573 = vmatpush3.xpose.msk.msra.mxu0 %vm1009_vm3, %v2311_v26  ;;  %3574 = vmatprep.mubr.msk.f32.mxu0 %vm3934_vm1, %v3935_v7  ;;  %v3669_v26 = vpack.c.bf16 %v1803_v25, %v1802_v24 }
 0x899   : > { %3582 = vmatprep.subr.mxu0 %v3935_v7 }
 0x89a   : > { %v2309_v28 = vpop.permute.xlu0 %2308 }
 0x89b   : > { %3575 = vmatmul.mubr.msk.f32.vlgmr.msra.gmra.mrb[12].mxu0 %vm1009_vm3, %v2309_v28  ;;  %v1805_v28 = vld [vmem:[%s4649_s2 + $0x18] sm:$0xff] }
 0x89c   : > { %3583 = vmatpush3.xpose.msk.msra.mxu0 %vm1009_vm3, %v2477_v29  ;;  %3584 = vmatprep.mubr.msk.f32.mxu0 %vm3934_vm1, %v3935_v7  ;;  %v3672_v29 = vpack.c.bf16 %v1805_v28, %v1804_v27 }
 0x89d   : > { %3668 = vmatprep.subr.bf16.mxu0 %v3933_v4 }
 0x89e   : > { %v2475_v30 = vpop.permute.xlu0 %2474 }
 0x89f   : > { %3585 = vmatmul.mubr.msk.f32.vlgmr.msra.gmra.mrb[14].mxu0 %vm1009_vm3, %v2475_v30 }
 0x8a0   : > { %3600 = vmatprep.mubr.msk.f32.mxu0 %vm3934_vm1, %v3935_v7  ;;  %3670 = vmatpush3.bf16.msra.mxu0 %v3669_v26 }
 0x8a1   : > { %3671 = vmatprep.subr.bf16.mxu0 %v3933_v4 }
 0x8a4   : > { %3673 = vmatpush3.bf16.msra.mxu0 %v3672_v29 }
 0x8a5   : > { %3680 = vmatprep.subr.bf16.mxu0 %v3933_v4 }
 0x8f7   : > { %v2050_v31 = vpop.f32.mrb[14].mxu1 }
 0x8f8   : > { %v2054_v32 = vmul.f32 0.35355338, %v2050_v31  ;;  %v3556_v33 = vpop.f32.mrb[15].mxu1 }
 0x8fa   : > { %v2055_v34 = vsel %vm1009_vm3, %v2054_v32, -inf }
 0x8fb   : > { %2056 = vmax.xlane.f32.xlu1 %v2055_v34 }
 0x96a   : > { %v2216_v35 = vpop.f32.mrb[10].mxu0 }
 0x96b   : > { %v2220_v36 = vmul.f32 0.35355338, %v2216_v35  ;;  %v3566_v37 = vpop.f32.mrb[11].mxu0 }
 0x96d   : > { %v2221_v38 = vsel %vm1009_vm3, %v2220_v36, -inf }
 0x96e   : > { %2222 = vmax.xlane.f32.xlu0 %v2221_v38  ;;  %v2382_v39 = vpop.f32.mrb[12].mxu0 }
 0x96f   : > { %v2386_v40 = vmul.f32 0.35355338, %v2382_v39  ;;  %v3576_v41 = vpop.f32.mrb[13].mxu0 }
 0x971   : > { %v2387_v42 = vsel %vm1009_vm3, %v2386_v40, -inf }
 0x972   : > { %2388 = vmax.xlane.f32.xlu0 %v2387_v42  ;;  %v2548_v43 = vpop.f32.mrb[14].mxu0 }
 0x973   : > { %v2552_v44 = vmul.f32 0.35355338, %v2548_v43  ;;  %v3586_v45 = vpop.f32.mrb[15].mxu0 }
 0x975   : > { %v2553_v46 = vsel %vm1009_vm3, %v2552_v44, -inf }
 0x976   : > { %2554 = vmax.xlane.f32.xlu1 %v2553_v46 }
 0x987   : > { %2232 = vrot.lane.b32.xlu1 %v4359_v20, %s3939_s25  ;;  %s4651_s25 = sld [smem:[#allocation29_spill]] }
 0x988   : > { %v2057_v47 = vpop.xlane.xlu1 %2056 }
 0x989   : > { %v2058_v48 = vsub.f32 %v2054_v32, %v2057_v47 }
 0x98b   : > { %v2059_v49 = vmul.f32 1.442695, %v2058_v48 }
 0x98d   : > { %3817 = vpow2.f32 %v2059_v49 }
 0x997   : > { %v3818_v50 = vpop.eup %3817 }
 0x998   : > { %v2061_v51 = vsel %vm1009_vm3, %v3818_v50, 0.0 }
 0x999   : > { %2062 = vadd.xlane.f32.xlu0 %v2061_v51 }
 0x9af   : > { %2066 = vrot.lane.b32.xlu0 %v4359_v20, %s3937_s15 }
 0x9fb   : > { %v2223_v52 = vpop.xlane.xlu0 %2222 }
 0x9fc   : > { %v2224_v53 = vsub.f32 %v2220_v36, %v2223_v52  ;;  %v2760_v52 = vld [vmem:[%s4650_s13] sm:$0xff] }
 0x9fe   : > { %v2225_v54 = vmul.f32 1.442695, %v2224_v53  ;;  %v2761_v53 = vld [vmem:[%s4650_s13 + $0x8] sm:$0xff] }
 0x9ff   : > { %v2389_v55 = vpop.xlane.xlu0 %2388 }
 0xa00   : > { %3819 = vpow2.f32 %v2225_v54  ;;  %v2390_v9 = vsub.f32 %v2386_v40, %v2389_v55  ;;  %v3675_v54 = vpack.c.bf16 %v2761_v53, %v2760_v52  ;;  %v2763_v55 = vld [vmem:[%s4650_s13 + $0x18] sm:$0xff] }
 0xa02   : > { %v2391_v56 = vmul.f32 1.442695, %v2390_v9 }
 0xa03   : > { %v2555_v57 = vpop.xlane.xlu1 %2554 }
 0xa04   : > { %3821 = vpow2.f32 %v2391_v56  ;;  %v2556_v58 = vsub.f32 %v2552_v44, %v2555_v57  ;;  %v2845_v56 = vld [vmem:[%s4210_s1] sm:$0xff]  ;;  %v2846_v57 = vld [vmem:[%s4210_s1 + $0x8] sm:$0xff] }
 0xa06   : > { %v2557_v59 = vmul.f32 1.442695, %v2556_v58  ;;  %v2847_v58 = vld [vmem:[%s4210_s1 + $0x10] sm:$0xff] }
 0xa07   : > { %v2233_v8 = vpop.permute.xlu1 %2232 }
 0xa08   : > { %3823 = vpow2.f32 %v2557_v59  ;;  %v3681_v59 = vpack.c.bf16 %v2846_v57, %v2845_v56 }
 0xa0a   : > { %v3820_v60 = vpop.eup %3819 }
 0xa0b   : > { %v2227_v61 = vsel %vm1009_vm3, %v3820_v60, 0.0 }
 0xa0c   : > { %2228 = vadd.xlane.f32.xlu1 %v2227_v61 }
 0xa0e   : > { %v3822_v62 = vpop.eup %3821 }
 0xa0f   : > { %v2393_v63 = vsel %vm1009_vm3, %v3822_v62, 0.0 }
 0xa10   : > { %2394 = vadd.xlane.f32.xlu0 %v2393_v63  ;;  %v2850_v63 = vld [vmem:[%s4210_s1 + $0x28] sm:$0xff] }
 0xa12   : > { %v3824_v0 = vpop.eup %3823 }
 0xa13   : > { %v2559_v1 = vsel %vm1009_vm3, %v3824_v0, 0.0 }
 0xa14   : > { %2560 = vadd.xlane.f32.xlu1 %v2559_v1 }
 0xa25   : > { %2398 = vrot.lane.b32.xlu1 %v4359_v20, %s3938_s19 }
 0xa26   : > { %2564 = vrot.lane.b32.xlu0 %v4359_v20, %s3940_s0  ;;  %v2063_v2 = vpop.xlane.xlu0 %2062  ;;  %s4652_s0 = scalar_lea.vmem %s4651_s25, %s4134_s29  ;;  %s4655_s29 = sld [smem:[#allocation9_spill]] }
 0xa27   : > { %3825 = vrcp.f32 %v2063_v2  ;;  %v3369_v42 = vld [vmem:[%s4652_s0] ss:$0 sm:$0xff] }
 0xa2a   : > { %v2067_v3 = vpop.permute.xlu0 %2066 }
 0xa2b   : > { %3558 = vmatpush3.msra.mxu1 %v2067_v3 }
 0xa2c   : > { %3567 = vmatprep.subr.mxu1 %v3935_v7  ;;  %p3379_p1 = scmp.ne.s32.totalorder %s4655_s29, 1 }
 0xa2d   : > { %vm3951_vm8 = vmmov (!%p3379_p1), 0   ;;  %s4657_s3 = sld [smem:[#allocation37_spill]] (!%p3379_p1) }
 0xa31   : > { %v3826_v5 = vpop.eup %3825 }
 0xa32   : > { %v2065_v6 = vmul.f32 %v3826_v5, %v3818_v50 }
 0xa34   : > { %3560 = vmatmul.mubr.msk.f32.vlgmr.msra.gmra.mrb[16].mxu1 %vm1009_vm3, %v2065_v6  ;;  %v3371_v6 = vld [vmem:[%s4195_s11 + $0x1] ss:$0 sm:$0xff] }
 0xa35   : > { %3568 = vmatpush3.msra.mxu1 %v2233_v8  ;;  %3569 = vmatprep.mubr.msk.f32.mxu1 %vm3934_vm1, %v3935_v7 }
 0xa36   : > { %3577 = vmatprep.subr.mxu1 %v3935_v7 }
 0xa99   : > { %v2229_v10 = vpop.xlane.xlu1 %2228 }
 0xa9a   : > { %3827 = vrcp.f32 %v2229_v10  ;;  %v3372_v10 = vld [vmem:[%s4200_s26 + $0x1] ss:$0 sm:$0xff] }
 0xa9d   : > { %v2395_v11 = vpop.xlane.xlu0 %2394 }
 0xa9e   : > { %3829 = vrcp.f32 %v2395_v11 }
 0xaa1   : > { %v2561_v13 = vpop.xlane.xlu1 %2560  ;;  %v2565_v19 = vpop.permute.xlu0 %2564 }
 0xaa2   : > { %3831 = vrcp.f32 %v2561_v13 }
 0xaa4   : > { %v3828_v14 = vpop.eup %3827 }
 0xaa5   : > { %v2231_v12 = vmul.f32 %v3828_v14, %v3820_v60  ;;  %v2399_v15 = vpop.permute.xlu1 %2398  ;;  %v2848_v60 = vld [vmem:[%s4210_s1 + $0x18] sm:$0xff]  ;;  %v2851_v14 = vld [vmem:[%s4210_s1 + $0x30] sm:$0xff] }
 0xaa6   : > { %v3684_v61 = vpack.c.bf16 %v2848_v60, %v2847_v58 }
 0xaa7   : > { %3570 = vmatmul.mubr.msk.f32.vlgmr.msra.gmra.mrb[18].mxu1 %vm1009_vm3, %v2231_v12  ;;  %v2852_v12 = vld [vmem:[%s4210_s1 + $0x38] sm:$0xff] }
 0xaa8   : > { %v3830_v16 = vpop.eup %3829  ;;  %3578 = vmatpush3.msra.mxu1 %v2399_v15  ;;  %3579 = vmatprep.mubr.msk.f32.mxu1 %vm3934_vm1, %v3935_v7  ;;  %v3690_v15 = vpack.c.bf16 %v2852_v12, %v2851_v14 }
 0xaa9   : > { %v2397_v18 = vmul.f32 %v3830_v16, %v3822_v62  ;;  %3587 = vmatprep.subr.mxu1 %v3935_v7  ;;  %v2849_v62 = vld [vmem:[%s4210_s1 + $0x20] sm:$0xff] }
 0xaab   : > { %3580 = vmatmul.mubr.msk.f32.vlgmr.msra.gmra.mrb[20].mxu1 %vm1009_vm3, %v2397_v18 }
 0xaac   : > { %v3832_v20 = vpop.eup %3831  ;;  %3588 = vmatpush3.msra.mxu1 %v2565_v19  ;;  %3589 = vmatprep.mubr.msk.f32.mxu1 %vm3934_vm1, %v3935_v7 }
 0xaad   : > { %v2563_v21 = vmul.f32 %v3832_v20, %v3824_v0  ;;  %3674 = vmatprep.subr.bf16.mxu1 %v3933_v4  ;;  %v3687_v0 = vpack.c.bf16 %v2850_v63, %v2849_v62 }
 0xaaf   : > { %3590 = vmatmul.mubr.msk.f32.vlgmr.msra.gmra.mrb[22].mxu1 %vm1009_vm3, %v2563_v21  ;;  %v3375_v21 = vld [vmem:[%s892_s7] ss:$0 sm:$0xff]  ;;  %s4656_s7 = sld [smem:[#allocation36_spill]] (!%p3379_p1) }
 0xab0   : > { %3611 = vmatprep.mubr.msk.f32.mxu1 %vm3934_vm1, %v3935_v7  ;;  %3676 = vmatpush3.bf16.msra.mxu1 %v3675_v54 }
 0xab1   : > { %3677 = vmatprep.subr.bf16.mxu1 %v3933_v4 }
 0xb07   : > { %v2138_v22 = vpop.f32.mrb[16].mxu1 }
 0xb08   : > { %v3561_v23 = vpop.f32.mrb[17].mxu1 }
 0xb7a   : > { %v2304_v30 = vpop.f32.mrb[18].mxu1 }
 0xb7b   : > { %2641 = vrot.lane.b32.xlu1 %v2304_v30, %s3947_s8  ;;  %v3571_v31 = vpop.f32.mrb[19].mxu1 }
 0xb7e   : > { %v2470_v32 = vpop.f32.mrb[20].mxu1 }
 0xb7f   : > { %2645 = vrot.lane.b32.xlu0 %v2470_v32, %s3948_s9  ;;  %v3581_v33 = vpop.f32.mrb[21].mxu1 }
 0xb82   : > { %v2636_v34 = vpop.f32.mrb[22].mxu1 }
 0xb83   : > { %2649 = vrot.lane.b32.xlu1 %v2636_v34, %s3949_s10  ;;  %v3591_v35 = vpop.f32.mrb[23].mxu1 }
 0xbed   : > { %v2642_v36 = vpop.permute.xlu1 %2641 }
 0xbee   : > { %v2652_v38 = vsel %vm1009_vm3, %v2138_v22, %v2642_v36  ;;  %v3377_v36 = vld [vmem:[%s4195_s11 + $0x2] ss:$0 sm:$0xff] }
 0xbf1   : > { %v2646_v37 = vpop.permute.xlu0 %2645 }
 0xbf2   : > { %v2653_v39 = vsel %vm1687_vm5, %v2652_v38, %v2646_v37  ;;  %v3378_v38 = vld [vmem:[%s4200_s26 + $0x2] ss:$0 sm:$0xff] }
 0xbf5   : > { %v2650_v40 = vpop.permute.xlu1 %2649 }
 0xbf6   : > { %v2654_v41 = vsel %vm1689_vm6, %v2653_v39, %v2650_v40 }
 0xbf7   : > { %3601 = vmatmul.mubr.msk.f32.vlgmr.msra.gmra.mrb[16].mxu0 %vm932_vm2, %v2654_v41  ;;  %v2965_v41 = vld [vmem:[%s4656_s7] sm:$0xff] (!%p3379_p1) }
 0xbf8   : > { %3630 = vmatprep.mubr.msk.f32.mxu0 %vm3934_vm1, %v3935_v7  ;;  %3682 = vmatpush3.bf16.msra.mxu0 %v3681_v59 }
 0xbf9   : > { %3683 = vmatprep.subr.bf16.mxu0 %v3933_v4 }
 0xbfc   : > { %3685 = vmatpush3.bf16.msra.mxu0 %v3684_v61 }
 0xbfd   : > { %3686 = vmatprep.subr.bf16.mxu0 %v3933_v4 }
 0xc00   : > { %3688 = vmatpush3.bf16.msra.mxu0 %v3687_v0 }
 0xc01   : > { %3689 = vmatprep.subr.bf16.mxu0 %v3933_v4  ;;  %v3373_v4 = vld [vmem:[%s884_s23] ss:$0 sm:$0xff] }
 0xc04   : > { %3691 = vmatpush3.bf16.msra.mxu0 %v3690_v15 }
 0xcca   : > { %v2730_v43 = vpop.f32.mrb[16].mxu0 }
 0xccb   : > { %v2731_v44 = vadd.f32 %v3369_v42, %v2730_v43  ;;  %v3602_v45 = vpop.f32.mrb[17].mxu0  ;;  %v2966_v42 = vld [vmem:[%s4656_s7 + $0x8] sm:$0xff] (!%p3379_p1)  ;;  %v2967_v43 = vld [vmem:[%s4656_s7 + $0x10] sm:$0xff] (!%p3379_p1) }
 0xccc   : > { %v3693_v45 = vpack.c.bf16 (!%p3379_p1), %v2966_v42, %v2965_v41 }
 0xccd   : > { %v2734_v46 = vadd.f32 %v2731_v44, %v4353_v17  ;;  %v2762_v17 = vld [vmem:[%s4650_s13 + $0x10] sm:$0xff]  ;;  %v3950_v44 = vmov (!%p3379_p1), 0.0|0.0  }
 0xcce   : > { %v3678_v9 = vpack.c.bf16 %v2763_v55, %v2762_v17  ;;  %3692 = vmatprep.subr.bf16.mxu0 (!%p3379_p1), %v3950_v44 }
 0xccf   : > { %v2737_v47 = vsel %vm932_vm2, %v2734_v46, 0.0 }
 0xcd0   : > { %2738 = vadd.xlane.f32.xlu0 %v2737_v47  ;;  %3679 = vmatpush3.bf16.msra.mxu1 %v3678_v9  ;;  %v3952_v47 = vmov (!%p3379_p1), 0.0  }
 0xd5d   : > { %v2739_v48 = vpop.xlane.xlu0 %2738 }
 0xd5e   : > { %v2740_v49 = vmul.f32 0.03125, %v2739_v48 }
 0xd60   : > { %v2741_v7 = vsub.f32 %v2734_v46, %v2740_v49  ;;  %v2968_v46 = vld [vmem:[%s4656_s7 + $0x18] sm:$0xff] (!%p3379_p1)  ;;  %v3380_v49 = vld [vmem:[%s4657_s3] ss:$0 sm:$0xff] (!%p3379_p1) }
 0xd61   : > { %v3696_v48 = vpack.c.bf16 (!%p3379_p1), %v2968_v46, %v2967_v43 }
 0xd62   : > { %v2742_v50 = vmul.f32 %v2741_v7, %v2741_v7 }
 0xd64   : > { %v2743_v51 = vsel %vm932_vm2, %v2742_v50, 0.0 }
 0xd65   : > { %2744 = vadd.xlane.f32.xlu1 %v2743_v51 }
 0xdf2   : > { %v2745_v1 = vpop.xlane.xlu1 %2744 }
 0xdf3   : > { %v2746_v2 = vmul.f32 0.03125, %v2745_v1 }
 0xdf5   : > { %v2747_v3 = vadd.f32 1e-05, %v2746_v2 }
 0xdf7   : > { %3833 = vrsqrt.f32 %v2747_v3 }
 0xe01   : > { %v3834_v5 = vpop.eup %3833 }
 0xe02   : > { %v2749_v8 = vmul.f32 %v3834_v5, %v2741_v7 }
 0xe04   : > { %v2754_v11 = vmul.f32 %v3371_v6, %v2749_v8 }
 0xe06   : > { %v2759_v13 = vadd.f32 %v3372_v10, %v2754_v11 }
 0xe08   : > { %3612 = vmatmul.mubr.msk.f32.vlgmr.msra.gmra.mrb[24].mxu1 %vm932_vm2, %v2759_v13 }
 0xedb   : > { %v2840_v16 = vpop.f32.mrb[24].mxu1 }
 0xedc   : > { %v2841_v18 = vadd.f32 %v3373_v4, %v2840_v16  ;;  %v3613_v19 = vpop.f32.mrb[25].mxu1 }
 0xede   : > { %v2844_v20 = vmax.f32 %v2841_v18, 0.0 }
 0xee0   : > { %3631 = vmatmul.mubr.msk.f32.vlgmr.msra.gmra.mrb[18].mxu0 %vm2860_vm7, %v2844_v20 }
 0xee1   : > { %3641 = vmatprep.mubr.msk.f32.mxu0 (!%p3379_p1), %vm3951_vm8, %v3952_v47  ;;  %3694 = vmatpush3.bf16.msra.mxu0 (!%p3379_p1), %v3693_v45 }
 0xee2   : > { %3695 = vmatprep.subr.bf16.mxu0 (!%p3379_p1), %v3950_v44 }
 0xee5   : > { %3697 = vmatpush3.bf16.msra.mxu0 (!%p3379_p1), %v3696_v48 }
 0xfb3   : > { %v2930_v22 = vpop.f32.mrb[18].mxu0 }
 0xfb4   : > { %v2931_v23 = vadd.f32 %v3375_v21, %v2930_v22  ;;  %v3632_v24 = vpop.f32.mrb[19].mxu0 }
 0xfb6   : > { %v2934_v25 = vadd.f32 %v2931_v23, %v2759_v13 }
 0xfb8   : > { %v2937_v26 = vsel %vm932_vm2, %v2934_v25, 0.0 }
 0xfb9   : > { %2938 = vadd.xlane.f32.xlu0 %v2937_v26 }
0x1046   : > { %v2939_v27 = vpop.xlane.xlu0 %2938 }
0x1047   : > { %v2940_v28 = vmul.f32 0.03125, %v2939_v27 }
0x1049   : > { %v2941_v29 = vsub.f32 %v2934_v25, %v2940_v28 }
0x104b   : > { %v2942_v30 = vmul.f32 %v2941_v29, %v2941_v29 }
0x104d   : > { %v2943_v31 = vsel %vm932_vm2, %v2942_v30, 0.0 }
0x104e   : > { %2944 = vadd.xlane.f32.xlu0 %v2943_v31 }
0x10db   : > { %v2945_v32 = vpop.xlane.xlu0 %2944 }
0x10dc   : > { %v2946_v33 = vmul.f32 0.03125, %v2945_v32 }
0x10de   : > { %v2947_v34 = vadd.f32 1e-05, %v2946_v33 }
0x10e0   : > { %3835 = vrsqrt.f32 %v2947_v34 }
0x10ea   : > { %v3836_v35 = vpop.eup %3835 }
0x10eb   : > { %v2949_v37 = vmul.f32 %v3836_v35, %v2941_v29  ;;  %2964 = sbr.rel (%p3379_p1) target bundleno = 4552 (0x11c8), region = 104 }
0x10ed   : > { %v2954_v39 = vmul.f32 %v3377_v36, %v2949_v37 }
0x10ef   : > { %v2959_v40 = vadd.f32 %v3378_v38, %v2954_v39 }
0x10f1   : > { %2960 = vst.msk [vmem:[#allocation2] sm:$0xff] %vm932_vm2, %v2959_v40  ;;  %3642 = vmatmul.mubr.msk.f32.vlgmr.msra.gmra.mrb[0].mxu0 (!%p3379_p1), %vm932_vm2, %v2959_v40 }
0x11c4   : > { %v3045_v7 = vpop.f32.mrb[0].mxu0 }
0x11c5   : > { %v3046_v50 = vadd.f32 %v3380_v49, %v3045_v7  ;;  %v3643_v51 = vpop.f32.mrb[1].mxu0 }
0x11c7   : > { %3049 = vst [vmem:[%s821_s21] sm:$0xff] %v3046_v50 }
0x11c8 PF: > { %s4658_s20 = sld [smem:[#allocation10_spill]]  ;;  %s4659_s28 = sld [smem:[#allocation7_spill]] }
0x11c9   : > { %s4661_s25 = sld [smem:[#allocation38_spill]]  ;;  %s3064_s18 = sshll.u32 %s821_s21, 4  ;;  %s3065_s18 = int_to_ptr.vmem [resolvable:$true] %s3064_s18 }
0x11ca   : > { %s3837_s24 = scalar_lea.vmem %s3065_s18, 128  ;;  %s3953_s5 = smov [#allocation3]  }
0x11cb   : > { %p3838_p2 = scmp.ne.s32.totalorder %s3065_s18, %s3837_s24  ;;  %s3841_s8 = sshll.u32 %s3953_s5, 4  ;;  %s3842_s8 = int_to_ptr.vmem [resolvable:$false] %s3841_s8 }
0x11cc   : > { %s3843_s29 = scalar_lea.vmem %s3842_s8, 256  ;;  %p3844_p6 = scmp.lt.s32.totalorder %s3065_s18, %s3842_s8 }
0x11cd   : > { %p3839_p4 = pnand %p3838_p2, %p4103_p3  ;;  %p3845_p7 = scmp.lt.s32.totalorder %s3843_s29, %s3837_s24 }
0x11ce   : > { %s3383_s13 = sshll.u32 %s4658_s20, 7  ;;  %s4662_s30 = sand.u32 1, %s4659_s28  }
0x11cf   : > { %s4503_s0 = scalar_lea.hbm %s4661_s25, %s3383_s13  ;;  %s3051_s16 = scalar_lea.sflag [#allocation4], %s4662_s30 }
0x11d0   : > { %p3840_p5 = pneg %p3839_p4  ;;  %p3846_p8 = por %p3845_p7, %p3844_p6 }
0x11d2   : > { %p3847_p10 = pnand %p3846_p8, %p3840_p5 }
0x11d4   : > { %3850 = shalt.err (!%p3847_p10)
}
0x11d5   : > { %s3851_s22 = scalar_lea.hbm %s4503_s0, 128  ;;  %s3855_s1 = scalar_lea.hbm %s4661_s25, 256 }
0x11d6   : > { %p3852_p11 = scmp.ne.s32.totalorder %s4503_s0, %s3851_s22  ;;  %p3856_p0 = scmp.lt.u32.totalorder %s4503_s0, %s4661_s25 }
0x11d7   : > { %p3857_p1 = scmp.lt.u32.totalorder %s3855_s1, %s3851_s22  ;;  %p3859_p4 = scmp.lt.u32.totalorder %s3851_s22, %s4503_s0 }
0x11d8   : > { %p3853_p12 = pnand %p3852_p11, %p4103_p3 }
0x11d9   : > { %p3858_p2 = por %p3857_p1, %p3856_p0 }
0x11da   : > { %p3854_p13 = pneg %p3853_p12 }
0x11db   : > { %p3860_p5 = por %p3859_p4, %p3858_p2 }
0x11dd   : > { %p3861_p6 = pnand %p3860_p5, %p3854_p13 }
0x11df   : > { %3864 = shalt.err (!%p3861_p6)
}
0x11e0   : > { %3698 = dma.vmem_to_hbm [thread:$0]  (%p4103_p3), %s3065_s18, 128, %s4503_s0, %s3051_s16  }
0x11e1 PF: > { %s4663_s27 = sld [smem:[#allocation13_spill]]  ;;  %s4664_s17 = sld [smem:[#allocation6_spill]] }
0x11e7   : > { %p3704_p7 = scmp.ge.s32.totalorder %s4663_s27, 2  ;;  %s3076_s26 = sand.u32 1, %s4664_s17  }
0x11e8   : > { %s3077_s14 = scalar_lea.sflag [#allocation4], %s3076_s26 }
0x11e9   : > { %p3701_p8 = pnand %p3704_p7, %p4113_p9 }
0x11eb   : > { %3898 = dma.done.wait (!%p3701_p8), %s3077_s14, 128  }
0x11ec   : > { %3900 = vsyncadd (!%p3701_p8), %s3077_s14, 4294967168  ;;  %s32_s23 = sadd.s32 1, %s4663_s27   ;;  %s4666_s0 = sld [smem:[#allocation7_spill]] }
0x11ed   : > { %p29_p10 = scmp.ge.s32.totalorder %s32_s23, 6   ;;  %s4667_s30 = sld [smem:[#allocation8_spill]] }
0x11ee   : > { %s4668_s20 = sld [smem:[#allocation18_spill]]  ;;  %s4669_s21 = sld [smem:[#allocation11_spill]] }
0x11ef   : > { %s4670_s1 = sld [smem:[#allocation12_spill]]  ;;  %s4671_s22 = sld [smem:[#allocation14_spill]] }
0x11f0   : > { %s4672_s2 = sld [smem:[#allocation16_spill]]  ;;  %31 = sbr.rel (!%p29_p10) target bundleno = 24 (0x18), region = 187 }
0x11f7   :  { %3082 = vsyncpa [#allocation4], 1 }
0x11f8   :  { %3084 = vsyncpa [#allocation4 + $0x1], 1 }

</bundles_post_ra>
